<compile_context>
chip_gen: v7x
topology: tpu7x:2x2x1
jax: 0.10.0
libtpu: 0.0.40
codegen_flags: <defaults>
</compile_context>

<pallas_src>
import math

import jax
import jax.numpy as jnp
from jax.experimental import pallas as pl
from jax.experimental.pallas import tpu as pltpu


# ---------------- synthetic Config (shapes consistent with the forward) -------
class Config:
    T = 4            # conv1 input channels (temporal depth)
    K_E = 8          # conv1 / conv2 output channels == attention sequence length
    KERNEL_1 = 5
    STRIDE_1 = 1
    KERNEL_2 = 5
    STRIDE_2 = 1
    P_2 = 8
    V = 8


NUM_HEADS = 4
INPUT_DIM = 64        # embed_dim E = H2 * W2 after the two convs (8 * 8)
HIDDEN_DIM = 128
LN_EPS = 1e-5         # PyTorch nn.LayerNorm default
MATMUL_DTYPE = jnp.bfloat16   # MXU operand dtype; accumulation is always f32
NEG_INF = -1e30

# packed-parameter row indices (pvec, shape (8, 2E + H*E))
ROW_LN1_G, ROW_LN1_B, ROW_LN2_G, ROW_LN2_B = 0, 1, 2, 3
ROW_BO, ROW_B2, ROW_B1, ROW_BPROJ = 4, 5, 6, 7


def _vmem_spec():
    # whole-array block resident in VMEM (no grid -> single pipeline step)
    return pl.BlockSpec(memory_space=pltpu.MemorySpace.VMEM)


# ===================== Pallas kernel 1: conv1 as one GEMM =====================
def _conv1_gemm_kernel(xcol_ref, w_ref, b_ref, out_ref):
    # xcol_ref: (K, B*M) bf16   w_ref: (Cout, K) bf16   b_ref: (Cout, 1) f32
    # out_ref:  (Cout, B*M) f32  -- lane-dense along B*M
    acc = jnp.dot(w_ref[...], xcol_ref[...], preferred_element_type=jnp.float32)
    out_ref[...] = acc + b_ref[...]


# ============ Pallas kernel 2: conv2 GEMM + transformer AttentionBlock ========
def _conv2_attn_kernel(xstack_ref, w2bd_ref, c2b_ref, pvec_ref,
                       wproj_ref, w1_ref, w2_ref, out_ref, proj_s):
    G, E = out_ref.shape               # tokens (all batches), embed dim
    H = NUM_HEADS
    D = E // H
    HG = H * G
    C2 = Config.K_E
    B = G // C2                        # original batch size
    HID = w1_ref.shape[1]

    # ---- conv2: one block-diagonal GEMM, rows already in torch reshape order --
    # row g = b*C2 + c of the result is row g of torch's raw
    # conv_out(B,C,H2,W2).reshape(C, B, H2*W2) buffer flattened over (L, N).
    x = jnp.dot(w2bd_ref[...], xstack_ref[...],
                preferred_element_type=jnp.float32) + c2b_ref[...]       # (G, E) f32

    def layer_norm(v, gamma, beta):
        mu = jnp.mean(v, axis=-1, keepdims=True)
        var = jnp.mean((v - mu) * (v - mu), axis=-1, keepdims=True)
        return (v - mu) * jax.lax.rsqrt(var + LN_EPS) * gamma + beta

    def gelu_exact(v):
        # exact-erf GELU (PyTorch nn.GELU() default). erf via Abramowitz&Stegun
        # 7.1.26 (|abs err| <= 1.5e-7 ~= f32 eps), only exp/mul/add (VPU/EUP).
        z = v * (1.0 / math.sqrt(2.0))
        sgn = jnp.where(z >= 0.0, 1.0, -1.0)
        za = jnp.abs(z)
        t = 1.0 / (1.0 + 0.3275911 * za)
        poly = ((((1.061405429 * t - 1.453152027) * t + 1.421413741) * t
                 - 0.284496736) * t + 0.254829592) * t
        erf = sgn * (1.0 - poly * jnp.exp(-za * za))
        return 0.5 * v * (1.0 + erf)

    # ---- multi-head self-attention sublayer (residual) ------------------------
    y = layer_norm(x,
                   pvec_ref[ROW_LN1_G:ROW_LN1_G + 1, 0:E],
                   pvec_ref[ROW_LN1_B:ROW_LN1_B + 1, 0:E])               # (G, E) f32

    # one fused projection GEMM: columns [Q*scale | K | V'_0 .. V'_{H-1}] where
    # V'_h = (y @ Wv_h + bv_h) @ Wo_h  (out-projection folded in at prep time).
    proj = jnp.dot(y.astype(MATMUL_DTYPE), wproj_ref[...],
                   preferred_element_type=jnp.float32)
    proj = proj + pvec_ref[ROW_BPROJ:ROW_BPROJ + 1, :]                   # (G, 2E+H*E)
    proj_s[...] = proj                                                   # f32 scratch

    # head fold via cheap static ref-slice loads + sublane concats: row r = h*G + g
    q2 = jnp.concatenate(
        [proj_s[:, h * D:(h + 1) * D] for h in range(H)], axis=0)        # (HG, D)
    k2 = jnp.concatenate(
        [proj_s[:, E + h * D:E + (h + 1) * D] for h in range(H)], axis=0)
    vf = jnp.concatenate(
        [proj_s[:, 2 * E + h * E:2 * E + (h + 1) * E] for h in range(H)], axis=0)  # (HG, E)

    # one (HG, HG) score matmul; 1/sqrt(D) already folded into Q.
    s = jax.lax.dot_general(q2.astype(MATMUL_DTYPE), k2.astype(MATMUL_DTYPE),
                            (((1,), (1,)), ((), ())),
                            preferred_element_type=jnp.float32)          # (HG, HG)

    # in-kernel block-diagonal mask: valid iff same head block AND same batch.
    ri = jax.lax.broadcasted_iota(jnp.int32, (HG, HG), 0)
    ci = jax.lax.broadcasted_iota(jnp.int32, (HG, HG), 1)
    same_head = None
    for h in range(H):                     # pure comparisons, no integer div
        t = ((ri >= h * G) & (ri < (h + 1) * G)
             & (ci >= h * G) & (ci < (h + 1) * G))
        same_head = t if same_head is None else (same_head | t)
    if B & (B - 1) == 0:                   # batch id == r mod B (G is divisible by B)
        same_batch = jnp.bitwise_and(ri, B - 1) == jnp.bitwise_and(ci, B - 1)
    else:                                  # general-B fallback via exact float floor-div
        rf, cf = ri.astype(jnp.float32), ci.astype(jnp.float32)
        rb = rf - jnp.floor((rf + 0.5) * (1.0 / B)) * B
        cb = cf - jnp.floor((cf + 0.5) * (1.0 / B)) * B
        same_batch = rb == cb
    s = jnp.where(same_head & same_batch, s, NEG_INF)

    m = jnp.max(s, axis=-1, keepdims=True)
    e = jnp.exp(s - m)
    den = jnp.sum(e, axis=-1, keepdims=True)
    p = e * pl.reciprocal(den, approx=True)                              # (HG, HG) f32

    # one PV matmul; rows already carry the out-projection (folded into V').
    attn_stacked = jnp.dot(p.astype(MATMUL_DTYPE), vf.astype(MATMUL_DTYPE),
                           preferred_element_type=jnp.float32)           # (HG, E)
    # concat(heads) @ Wo == sum over the H row blocks (all Wo-projected already)
    attn = attn_stacked[0:G]
    for h in range(1, H):
        attn = attn + attn_stacked[h * G:(h + 1) * G]
    x = x + attn + pvec_ref[ROW_BO:ROW_BO + 1, 0:E]

    # ---- feed-forward sublayer (residual) -------------------------------------
    y2 = layer_norm(x,
                    pvec_ref[ROW_LN2_G:ROW_LN2_G + 1, 0:E],
                    pvec_ref[ROW_LN2_B:ROW_LN2_B + 1, 0:E])
    h1 = jnp.dot(y2.astype(MATMUL_DTYPE), w1_ref[...],
                 preferred_element_type=jnp.float32) + pvec_ref[ROW_B1:ROW_B1 + 1, 0:HID]
    h1 = gelu_exact(h1)
    h2 = jnp.dot(h1.astype(MATMUL_DTYPE), w2_ref[...],
                 preferred_element_type=jnp.float32) + pvec_ref[ROW_B2:ROW_B2 + 1, 0:E]
    out_ref[...] = x + h2


# =============================== im2col glue ==================================
# TODO(synk): the conv window gather (im2col) stays as XLA glue feeding the
# Pallas GEMMs; doing the gather in-kernel would need ragged (12x12) sublane
# reshapes / hundreds of unaligned slices that Mosaic does not reliably lower.
def _im2col(x_nchw, ksize, stride):
    """(B, C, H, W) -> (C*k*k, B*OH*OW); rows (c, ki, kj), cols (b, oh, ow)."""
    B, C, H, W = x_nchw.shape
    OH = (H - ksize) // stride + 1
    OW = (W - ksize) // stride + 1
    slabs = []
    for i in range(ksize):
        for j in range(ksize):
            slabs.append(x_nchw[:, :, i:i + stride * OH:stride,
                                j:j + stride * OW:stride])
    pat = jnp.stack(slabs, axis=0)                    # (k*k, B, C, OH, OW)
    pat = jnp.transpose(pat, (2, 0, 1, 3, 4))         # (C, k*k, B, OH, OW)
    return pat.reshape(C * ksize * ksize, B * OH * OW), OH, OW


def _im2col_batched(x_nchw, ksize, stride):
    """(B, C, H, W) -> (B, C*k*k, OH*OW); rows (c, ki, kj), cols (oh, ow)."""
    B, C, H, W = x_nchw.shape
    OH = (H - ksize) // stride + 1
    OW = (W - ksize) // stride + 1
    slabs = []
    for i in range(ksize):
        for j in range(ksize):
            slabs.append(x_nchw[:, :, i:i + stride * OH:stride,
                                j:j + stride * OW:stride])
    pat = jnp.stack(slabs, axis=2)                    # (B, C, k*k, OH, OW)
    return pat.reshape(B, C * ksize * ksize, OH * OW), OH, OW


# ============================== full forward pass =============================
def temporal_attention_forward(x, params):
    """x: (B, T, H, W) NCHW, identical to the PyTorch Conv2d input."""
    B = x.shape[0]
    C2 = Config.K_E
    H = NUM_HEADS

    # -------- conv1: a single lane-dense GEMM, batch folded into columns ------
    xcol1, OH1, OW1 = _im2col(x, Config.KERNEL_1, Config.STRIDE_1)    # (K1, B*M1)
    y1 = pl.pallas_call(
        _conv1_gemm_kernel,
        out_shape=jax.ShapeDtypeStruct((C2, B * OH1 * OW1), jnp.float32),
        in_specs=[_vmem_spec()] * 3,
        out_specs=_vmem_spec(),
    )(xcol1.astype(MATMUL_DTYPE), params["conv1_w"], params["conv1_b"])

    # (Cout, B*M1) -> NCHW for the conv2 window gather (XLA glue)
    y1 = jnp.transpose(y1.reshape(C2, B, OH1, OW1), (1, 0, 2, 3))     # (B, C2, 12, 12)

    # -------- conv2 + full AttentionBlock fused into one kernel ---------------
    xcol2, OH2, OW2 = _im2col_batched(y1, Config.KERNEL_2, Config.STRIDE_2)
    E = OH2 * OW2                                                     # embed dim
    G = B * C2                                                        # total tokens
    assert E == INPUT_DIM and E % H == 0

    # stacked im2col columns (B*K2, E) + block-diagonal conv2 weight (G, B*K2):
    # one GEMM reproduces every per-batch conv while keeping rows g = b*C2 + c.
    K2 = xcol2.shape[1]
    xstack = xcol2.reshape(B * K2, E).astype(MATMUL_DTYPE)
    w2bd = jnp.kron(jnp.eye(B, dtype=jnp.float32),
                    params["conv2_w"]).astype(MATMUL_DTYPE)           # (G, B*K2)
    c2b_col = jnp.tile(params["conv2_b"], B).reshape(G, 1)            # f32 per-row bias

    attn_inputs = [xstack, w2bd, c2b_col, params["pvec"],
                   params["wproj"], params["w1"], params["w2"]]
    out = pl.pallas_call(
        _conv2_attn_kernel,
        out_shape=jax.ShapeDtypeStruct((G, E), jnp.float32),
        in_specs=[_vmem_spec()] * len(attn_inputs),
        out_specs=_vmem_spec(),
        scratch_shapes=[pltpu.VMEM((G, 2 * E + H * E), jnp.float32)],
    )(*attn_inputs)

    # torch: (L, N, E).reshape(N, L, E//P_2, E//V) is a raw row-major reshape;
    # our (G, E) output is already that buffer in row-major order.
    return out.reshape(B, C2, E // Config.P_2, E // Config.V)


# ============================== parameter setup ===============================
def init_params(key):
    """Random parameters in PyTorch layouts (as nn.Conv2d / nn.MultiheadAttention
    / nn.Linear store them)."""
    E, Hd = INPUT_DIM, HIDDEN_DIM
    ks = jax.random.split(key, 12)

    def u(k, shape, fan_in):
        bound = 1.0 / math.sqrt(fan_in)
        return jax.random.uniform(k, shape, jnp.float32, -bound, bound)

    fi1 = Config.T * Config.KERNEL_1 ** 2
    fi2 = Config.K_E * Config.KERNEL_2 ** 2
    return {
        "conv1_w": u(ks[0], (Config.K_E, Config.T, Config.KERNEL_1, Config.KERNEL_1), fi1),
        "conv1_b": u(ks[1], (Config.K_E,), fi1),
        "conv2_w": u(ks[2], (Config.K_E, Config.K_E, Config.KERNEL_2, Config.KERNEL_2), fi2),
        "conv2_b": u(ks[3], (Config.K_E,), fi2),
        "ln1_g": jnp.ones((E,), jnp.float32), "ln1_b": jnp.zeros((E,), jnp.float32),
        "ln2_g": jnp.ones((E,), jnp.float32), "ln2_b": jnp.zeros((E,), jnp.float32),
        "in_proj_w": u(ks[4], (3 * E, E), E),      # MultiheadAttention.in_proj_weight
        "in_proj_b": u(ks[5], (3 * E,), E),        # MultiheadAttention.in_proj_bias
        "out_proj_w": u(ks[6], (E, E), E),         # out_proj.weight
        "out_proj_b": u(ks[7], (E,), E),           # out_proj.bias
        "lin1_w": u(ks[8], (Hd, E), E), "lin1_b": u(ks[9], (Hd,), E),
        "lin2_w": u(ks[10], (E, Hd), Hd), "lin2_b": u(ks[11], (E,), Hd),
    }


def prepare_params(raw):
    """One-time conversion of PyTorch-layout params into kernel layouts:
    flattened conv GEMM weights, a single fused projection weight
    [Wq*scale | Wk | per-head (Wv_h @ Wo_h)], packed bias/LayerNorm table,
    bf16 MXU operands, f32 everything elementwise."""
    E, Hd, H = INPUT_DIM, HIDDEN_DIM, NUM_HEADS
    D = E // H
    scale = 1.0 / math.sqrt(D)

    wq = raw["in_proj_w"][0 * E:1 * E].T          # (E_in, E_out), torch head order
    wk = raw["in_proj_w"][1 * E:2 * E].T
    wv = raw["in_proj_w"][2 * E:3 * E].T
    bq = raw["in_proj_b"][0 * E:1 * E]
    bk = raw["in_proj_b"][1 * E:2 * E]
    bv = raw["in_proj_b"][2 * E:3 * E]
    wo = raw["out_proj_w"].T                      # (E concat-heads, E_out)

    # fold the output projection into the V projection per head: V'_h = V_h @ Wo_h
    wvo = [wv[:, h * D:(h + 1) * D] @ wo[h * D:(h + 1) * D, :] for h in range(H)]
    bvo = [bv[h * D:(h + 1) * D] @ wo[h * D:(h + 1) * D, :] for h in range(H)]

    wproj = jnp.concatenate([wq * scale, wk] + wvo, axis=1)      # (E, 2E + H*E)
    bproj = jnp.concatenate([bq * scale, bk] + bvo, axis=0)      # (2E + H*E,)

    W = 2 * E + H * E
    def row(vec):
        return jnp.pad(vec, (0, W - vec.shape[0]))
    pvec = jnp.stack([                                           # (8, 2E + H*E) f32
        row(raw["ln1_g"]), row(raw["ln1_b"]),
        row(raw["ln2_g"]), row(raw["ln2_b"]),
        row(raw["out_proj_b"]), row(raw["lin2_b"]),
        row(raw["lin1_b"]), bproj,
    ], axis=0).astype(jnp.float32)

    return {
        "conv1_w": raw["conv1_w"].reshape(Config.K_E, -1).astype(MATMUL_DTYPE),
        "conv1_b": raw["conv1_b"].reshape(-1, 1),
        "conv2_w": raw["conv2_w"].reshape(Config.K_E, -1),       # f32; kron'd per call
        "conv2_b": raw["conv2_b"],                               # (C2,) f32
        "pvec": pvec,
        "wproj": wproj.astype(MATMUL_DTYPE),
        "w1": raw["lin1_w"].T.astype(MATMUL_DTYPE),
        "w2": raw["lin2_w"].T.astype(MATMUL_DTYPE),
    }


if __name__ == "__main__":
    key = jax.random.PRNGKey(0)
    kx, kp = jax.random.split(key)
    x = jax.random.normal(kx, (2, Config.T, 16, 16), jnp.float32)   # (B, T, H, W)
    params = prepare_params(init_params(kp))

    fwd = jax.jit(temporal_attention_forward)
    out = fwd(x, params)
    jax.block_until_ready(out)

    expected = (2, Config.K_E, INPUT_DIM // Config.P_2, INPUT_DIM // Config.V)
    assert out.shape == expected, (out.shape, expected)
    assert bool(jnp.all(jnp.isfinite(out))), "non-finite values in output"
    print("KERNEL_OK")
</pallas_src>

<mosaic_0001>
module attributes {stable_mosaic.version = 11 : i64} {
  func.func @_conv1_gemm_kernel(%arg0: memref<100x288xbf16, #tpu.memory_space<vmem>>, %arg1: memref<8x100xbf16, #tpu.memory_space<vmem>>, %arg2: memref<8x1xf32, #tpu.memory_space<vmem>>, %arg3: memref<8x288xf32, #tpu.memory_space<vmem>>) attributes {dimension_semantics = [], scalar_prefetch = 0 : i64, scratch_operands = 0 : i64, tpu.core_type = #tpu.core_type<tc>} {
    %c0 = arith.constant 0 : index
    %c0_0 = arith.constant 0 : index
    %0 = vector.load %arg1[%c0, %c0_0] : memref<8x100xbf16, #tpu.memory_space<vmem>>, vector<8x100xbf16>
    %c0_1 = arith.constant 0 : index
    %c0_2 = arith.constant 0 : index
    %1 = vector.load %arg0[%c0_1, %c0_2] : memref<100x288xbf16, #tpu.memory_space<vmem>>, vector<100x288xbf16>
    %cst = arith.constant dense<0.000000e+00> : vector<8x288xf32>
    %2 = tpu.matmul %0, %1, %cst {dimension_numbers = #tpu.dot_dimension_numbers<[1], [0], [0], [1], [0, 0, 1, 1], [], []>} : vector<8x100xbf16>, vector<100x288xbf16>, vector<8x288xf32> -> vector<8x288xf32>
    %c0_3 = arith.constant 0 : index
    %c0_4 = arith.constant 0 : index
    %3 = vector.load %arg2[%c0_3, %c0_4] : memref<8x1xf32, #tpu.memory_space<vmem>>, vector<8x1xf32>
    %4 = vector.broadcast %3 : vector<8x1xf32> to vector<8x288xf32>
    %5 = arith.addf %2, %4 : vector<8x288xf32>
    %c0_5 = arith.constant 0 : index
    %c0_6 = arith.constant 0 : index
    %6 = vector.load %arg3[%c0_5, %c0_6] : memref<8x288xf32, #tpu.memory_space<vmem>>, vector<8x288xf32>
    tpu.vector_store %arg3[%c0_5, %c0_6], %5 {strides = array<i32>} : memref<8x288xf32, #tpu.memory_space<vmem>>, vector<8x288xf32>,
    return
  }
}

module attributes {stable_mosaic.version = 11 : i64} {
  func.func @_conv2_attn_kernel(%arg0: memref<400x64xbf16, #tpu.memory_space<vmem>>, %arg1: memref<16x400xbf16, #tpu.memory_space<vmem>>, %arg2: memref<16x1xf32, #tpu.memory_space<vmem>>, %arg3: memref<8x384xf32, #tpu.memory_space<vmem>>, %arg4: memref<64x384xbf16, #tpu.memory_space<vmem>>, %arg5: memref<64x128xbf16, #tpu.memory_space<vmem>>, %arg6: memref<128x64xbf16, #tpu.memory_space<vmem>>, %arg7: memref<16x64xf32, #tpu.memory_space<vmem>>, %arg8: memref<16x384xf32, #tpu.memory_space<vmem>>) attributes {dimension_semantics = [], scalar_prefetch = 0 : i64, scratch_operands = 1 : i64, tpu.core_type = #tpu.core_type<tc>} {
    %c0 = arith.constant 0 : index
    %c0_0 = arith.constant 0 : index
    %0 = vector.load %arg1[%c0, %c0_0] : memref<16x400xbf16, #tpu.memory_space<vmem>>, vector<16x400xbf16>
    %c0_1 = arith.constant 0 : index
    %c0_2 = arith.constant 0 : index
    %1 = vector.load %arg0[%c0_1, %c0_2] : memref<400x64xbf16, #tpu.memory_space<vmem>>, vector<400x64xbf16>
    %cst = arith.constant dense<0.000000e+00> : vector<16x64xf32>
    %2 = tpu.matmul %0, %1, %cst {dimension_numbers = #tpu.dot_dimension_numbers<[1], [0], [0], [1], [0, 0, 1, 1], [], []>} : vector<16x400xbf16>, vector<400x64xbf16>, vector<16x64xf32> -> vector<16x64xf32>
    %c0_3 = arith.constant 0 : index
    %c0_4 = arith.constant 0 : index
    %3 = vector.load %arg2[%c0_3, %c0_4] : memref<16x1xf32, #tpu.memory_space<vmem>>, vector<16x1xf32>
    %4 = vector.broadcast %3 : vector<16x1xf32> to vector<16x64xf32>
    %5 = arith.addf %2, %4 : vector<16x64xf32>
    %c0_5 = arith.constant 0 : index
    %c0_6 = arith.constant 0 : index
    %6 = vector.load %arg3[%c0_5, %c0_6] : memref<8x384xf32, #tpu.memory_space<vmem>>, vector<1x64xf32>
    %c1 = arith.constant 1 : index
    %c0_7 = arith.constant 0 : index
    %7 = vector.load %arg3[%c1, %c0_7] : memref<8x384xf32, #tpu.memory_space<vmem>>, vector<1x64xf32>
    %cst_8 = arith.constant dense<0.000000e+00> : vector<16xf32>
    %8 = vector.multi_reduction <add>, %5, %cst_8 [1] : vector<16x64xf32> to vector<16xf32>
    %9 = vector.shape_cast %8 : vector<16xf32> to vector<16x1xf32>
    %cst_9 = arith.constant 6.400000e+01 : f32
    %10 = vector.broadcast %cst_9 : f32 to vector<16x1xf32>
    %11 = arith.divf %9, %10 : vector<16x1xf32>
    %12 = vector.broadcast %11 : vector<16x1xf32> to vector<16x64xf32>
    %13 = arith.subf %5, %12 : vector<16x64xf32>
    %14 = vector.broadcast %11 : vector<16x1xf32> to vector<16x64xf32>
    %15 = arith.subf %5, %14 : vector<16x64xf32>
    %16 = arith.mulf %13, %15 : vector<16x64xf32>
    %cst_10 = arith.constant dense<0.000000e+00> : vector<16xf32>
    %17 = vector.multi_reduction <add>, %16, %cst_10 [1] : vector<16x64xf32> to vector<16xf32>
    %18 = vector.shape_cast %17 : vector<16xf32> to vector<16x1xf32>
    %cst_11 = arith.constant 6.400000e+01 : f32
    %19 = vector.broadcast %cst_11 : f32 to vector<16x1xf32>
    %20 = arith.divf %18, %19 : vector<16x1xf32>
    %21 = vector.broadcast %11 : vector<16x1xf32> to vector<16x64xf32>
    %22 = arith.subf %5, %21 : vector<16x64xf32>
    %cst_12 = arith.constant 9.99999974E-6 : f32
    %23 = vector.broadcast %cst_12 : f32 to vector<16x1xf32>
    %24 = arith.addf %20, %23 : vector<16x1xf32>
    %25 = math.rsqrt %24 : vector<16x1xf32>
    %26 = vector.broadcast %25 : vector<16x1xf32> to vector<16x64xf32>
    %27 = arith.mulf %22, %26 : vector<16x64xf32>
    %28 = vector.broadcast %6 : vector<1x64xf32> to vector<16x64xf32>
    %29 = arith.mulf %27, %28 : vector<16x64xf32>
    %30 = vector.broadcast %7 : vector<1x64xf32> to vector<16x64xf32>
    %31 = arith.addf %29, %30 : vector<16x64xf32>
    %32 = arith.truncf %31 : vector<16x64xf32> to vector<16x64xbf16>
    %c0_13 = arith.constant 0 : index
    %c0_14 = arith.constant 0 : index
    %33 = vector.load %arg4[%c0_13, %c0_14] : memref<64x384xbf16, #tpu.memory_space<vmem>>, vector<64x384xbf16>
    %cst_15 = arith.constant dense<0.000000e+00> : vector<16x384xf32>
    %34 = tpu.matmul %32, %33, %cst_15 {dimension_numbers = #tpu.dot_dimension_numbers<[1], [0], [0], [1], [0, 0, 1, 1], [], []>} : vector<16x64xbf16>, vector<64x384xbf16>, vector<16x384xf32> -> vector<16x384xf32>
    %c7 = arith.constant 7 : index
    %c0_16 = arith.constant 0 : index
    %35 = vector.load %arg3[%c7, %c0_16] : memref<8x384xf32, #tpu.memory_space<vmem>>, vector<1x384xf32>
    %36 = vector.broadcast %35 : vector<1x384xf32> to vector<16x384xf32>
    %37 = arith.addf %34, %36 : vector<16x384xf32>
    %c0_17 = arith.constant 0 : index
    %c0_18 = arith.constant 0 : index
    %38 = vector.load %arg8[%c0_17, %c0_18] : memref<16x384xf32, #tpu.memory_space<vmem>>, vector<16x384xf32>
    tpu.vector_store %arg8[%c0_17, %c0_18], %37 {strides = array<i32>} : memref<16x384xf32, #tpu.memory_space<vmem>>, vector<16x384xf32>,
    %c0_19 = arith.constant 0 : index
    %c0_20 = arith.constant 0 : index
    %39 = vector.load %arg8[%c0_19, %c0_20] : memref<16x384xf32, #tpu.memory_space<vmem>>, vector<16x16xf32>
    %c0_21 = arith.constant 0 : index
    %c16 = arith.constant 16 : index
    %40 = vector.load %arg8[%c0_21, %c16] : memref<16x384xf32, #tpu.memory_space<vmem>>, vector<16x16xf32>
    %c0_22 = arith.constant 0 : index
    %c32 = arith.constant 32 : index
    %41 = vector.load %arg8[%c0_22, %c32] : memref<16x384xf32, #tpu.memory_space<vmem>>, vector<16x16xf32>
    %c0_23 = arith.constant 0 : index
    %c48 = arith.constant 48 : index
    %42 = vector.load %arg8[%c0_23, %c48] : memref<16x384xf32, #tpu.memory_space<vmem>>, vector<16x16xf32>
    %43 = tpu.concatenate %39, %40, %41, %42 in 0 : vector<16x16xf32>, vector<16x16xf32>, vector<16x16xf32>, vector<16x16xf32> -> vector<64x16xf32>
    %c0_24 = arith.constant 0 : index
    %c64 = arith.constant 64 : index
    %44 = vector.load %arg8[%c0_24, %c64] : memref<16x384xf32, #tpu.memory_space<vmem>>, vector<16x16xf32>
    %c0_25 = arith.constant 0 : index
    %c80 = arith.constant 80 : index
    %45 = vector.load %arg8[%c0_25, %c80] : memref<16x384xf32, #tpu.memory_space<vmem>>, vector<16x16xf32>
    %c0_26 = arith.constant 0 : index
    %c96 = arith.constant 96 : index
    %46 = vector.load %arg8[%c0_26, %c96] : memref<16x384xf32, #tpu.memory_space<vmem>>, vector<16x16xf32>
    %c0_27 = arith.constant 0 : index
    %c112 = arith.constant 112 : index
    %47 = vector.load %arg8[%c0_27, %c112] : memref<16x384xf32, #tpu.memory_space<vmem>>, vector<16x16xf32>
    %48 = tpu.concatenate %44, %45, %46, %47 in 0 : vector<16x16xf32>, vector<16x16xf32>, vector<16x16xf32>, vector<16x16xf32> -> vector<64x16xf32>
    %c0_28 = arith.constant 0 : index
    %c128 = arith.constant 128 : index
    %49 = vector.load %arg8[%c0_28, %c128] : memref<16x384xf32, #tpu.memory_space<vmem>>, vector<16x64xf32>
    %c0_29 = arith.constant 0 : index
    %c192 = arith.constant 192 : index
    %50 = vector.load %arg8[%c0_29, %c192] : memref<16x384xf32, #tpu.memory_space<vmem>>, vector<16x64xf32>
    %c0_30 = arith.constant 0 : index
    %c256 = arith.constant 256 : index
    %51 = vector.load %arg8[%c0_30, %c256] : memref<16x384xf32, #tpu.memory_space<vmem>>, vector<16x64xf32>
    %c0_31 = arith.constant 0 : index
    %c320 = arith.constant 320 : index
    %52 = vector.load %arg8[%c0_31, %c320] : memref<16x384xf32, #tpu.memory_space<vmem>>, vector<16x64xf32>
    %53 = tpu.concatenate %49, %50, %51, %52 in 0 : vector<16x64xf32>, vector<16x64xf32>, vector<16x64xf32>, vector<16x64xf32> -> vector<64x64xf32>
    %54 = arith.truncf %43 : vector<64x16xf32> to vector<64x16xbf16>
    %55 = arith.truncf %48 : vector<64x16xf32> to vector<64x16xbf16>
    %cst_32 = arith.constant dense<0.000000e+00> : vector<64x64xf32>
    %56 = tpu.matmul %54, %55, %cst_32 {dimension_numbers = #tpu.dot_dimension_numbers<[1], [1], [0], [0], [0, 0, 1, 0], [], []>} : vector<64x16xbf16>, vector<64x16xbf16>, vector<64x64xf32> -> vector<64x64xf32>
    %57 = tpu.iota {dimensions = array<i32: 0>} : vector<64x64xi32>
    %58 = tpu.iota {dimensions = array<i32: 1>} : vector<64x64xi32>
    %c0_i32 = arith.constant 0 : i32
    %59 = vector.broadcast %c0_i32 : i32 to vector<64x64xi32>
    %60 = arith.cmpi sge, %57, %59 : vector<64x64xi32>
    %c16_i32 = arith.constant 16 : i32
    %61 = vector.broadcast %c16_i32 : i32 to vector<64x64xi32>
    %62 = arith.cmpi slt, %57, %61 : vector<64x64xi32>
    %63 = arith.andi %60, %62 : vector<64x64xi1>
    %c0_i32_33 = arith.constant 0 : i32
    %64 = vector.broadcast %c0_i32_33 : i32 to vector<64x64xi32>
    %65 = arith.cmpi sge, %58, %64 : vector<64x64xi32>
    %66 = arith.andi %63, %65 : vector<64x64xi1>
    %c16_i32_34 = arith.constant 16 : i32
    %67 = vector.broadcast %c16_i32_34 : i32 to vector<64x64xi32>
    %68 = arith.cmpi slt, %58, %67 : vector<64x64xi32>
    %69 = arith.andi %66, %68 : vector<64x64xi1>
    %c16_i32_35 = arith.constant 16 : i32
    %70 = vector.broadcast %c16_i32_35 : i32 to vector<64x64xi32>
    %71 = arith.cmpi sge, %57, %70 : vector<64x64xi32>
    %c32_i32 = arith.constant 32 : i32
    %72 = vector.broadcast %c32_i32 : i32 to vector<64x64xi32>
    %73 = arith.cmpi slt, %57, %72 : vector<64x64xi32>
    %74 = arith.andi %71, %73 : vector<64x64xi1>
    %c16_i32_36 = arith.constant 16 : i32
    %75 = vector.broadcast %c16_i32_36 : i32 to vector<64x64xi32>
    %76 = arith.cmpi sge, %58, %75 : vector<64x64xi32>
    %77 = arith.andi %74, %76 : vector<64x64xi1>
    %c32_i32_37 = arith.constant 32 : i32
    %78 = vector.broadcast %c32_i32_37 : i32 to vector<64x64xi32>
    %79 = arith.cmpi slt, %58, %78 : vector<64x64xi32>
    %80 = arith.andi %77, %79 : vector<64x64xi1>
    %81 = arith.ori %69, %80 : vector<64x64xi1>
    %c32_i32_38 = arith.constant 32 : i32
    %82 = vector.broadcast %c32_i32_38 : i32 to vector<64x64xi32>
    %83 = arith.cmpi sge, %57, %82 : vector<64x64xi32>
    %c48_i32 = arith.constant 48 : i32
    %84 = vector.broadcast %c48_i32 : i32 to vector<64x64xi32>
    %85 = arith.cmpi slt, %57, %84 : vector<64x64xi32>
    %86 = arith.andi %83, %85 : vector<64x64xi1>
    %c32_i32_39 = arith.constant 32 : i32
    %87 = vector.broadcast %c32_i32_39 : i32 to vector<64x64xi32>
    %88 = arith.cmpi sge, %58, %87 : vector<64x64xi32>
    %89 = arith.andi %86, %88 : vector<64x64xi1>
    %c48_i32_40 = arith.constant 48 : i32
    %90 = vector.broadcast %c48_i32_40 : i32 to vector<64x64xi32>
    %91 = arith.cmpi slt, %58, %90 : vector<64x64xi32>
    %92 = arith.andi %89, %91 : vector<64x64xi1>
    %93 = arith.ori %81, %92 : vector<64x64xi1>
    %c48_i32_41 = arith.constant 48 : i32
    %94 = vector.broadcast %c48_i32_41 : i32 to vector<64x64xi32>
    %95 = arith.cmpi sge, %57, %94 : vector<64x64xi32>
    %c64_i32 = arith.constant 64 : i32
    %96 = vector.broadcast %c64_i32 : i32 to vector<64x64xi32>
    %97 = arith.cmpi slt, %57, %96 : vector<64x64xi32>
    %98 = arith.andi %95, %97 : vector<64x64xi1>
    %c48_i32_42 = arith.constant 48 : i32
    %99 = vector.broadcast %c48_i32_42 : i32 to vector<64x64xi32>
    %100 = arith.cmpi sge, %58, %99 : vector<64x64xi32>
    %101 = arith.andi %98, %100 : vector<64x64xi1>
    %c64_i32_43 = arith.constant 64 : i32
    %102 = vector.broadcast %c64_i32_43 : i32 to vector<64x64xi32>
    %103 = arith.cmpi slt, %58, %102 : vector<64x64xi32>
    %104 = arith.andi %101, %103 : vector<64x64xi1>
    %105 = arith.ori %93, %104 : vector<64x64xi1>
    %c1_i32 = arith.constant 1 : i32
    %106 = vector.broadcast %c1_i32 : i32 to vector<64x64xi32>
    %107 = arith.andi %57, %106 : vector<64x64xi32>
    %c1_i32_44 = arith.constant 1 : i32
    %108 = vector.broadcast %c1_i32_44 : i32 to vector<64x64xi32>
    %109 = arith.andi %58, %108 : vector<64x64xi32>
    %110 = arith.cmpi eq, %107, %109 : vector<64x64xi32>
    %111 = arith.andi %105, %110 : vector<64x64xi1>
    %cst_45 = arith.constant -1.000000e+30 : f32
    %112 = vector.broadcast %cst_45 : f32 to vector<64x64xf32>
    %113 = arith.select %111, %56, %112 : vector<64x64xi1>, vector<64x64xf32>
    %cst_46 = arith.constant dense<0xFF800000> : vector<64xf32>
    %114 = vector.multi_reduction <maximumf>, %113, %cst_46 [1] : vector<64x64xf32> to vector<64xf32>
    %115 = vector.shape_cast %114 : vector<64xf32> to vector<64x1xf32>
    %116 = vector.broadcast %115 : vector<64x1xf32> to vector<64x64xf32>
    %117 = arith.subf %113, %116 : vector<64x64xf32>
    %118 = math.exp %117 : vector<64x64xf32>
    %cst_47 = arith.constant dense<0.000000e+00> : vector<64xf32>
    %119 = vector.multi_reduction <add>, %118, %cst_47 [1] : vector<64x64xf32> to vector<64xf32>
    %120 = vector.shape_cast %119 : vector<64xf32> to vector<64x1xf32>
    %121 = tpu.reciprocal %120 {approx = true} : vector<64x1xf32> -> vector<64x1xf32>
    %122 = vector.broadcast %121 : vector<64x1xf32> to vector<64x64xf32>
    %123 = arith.mulf %118, %122 : vector<64x64xf32>
    %124 = arith.truncf %123 : vector<64x64xf32> to vector<64x64xbf16>
    %125 = arith.truncf %53 : vector<64x64xf32> to vector<64x64xbf16>
    %cst_48 = arith.constant dense<0.000000e+00> : vector<64x64xf32>
    %126 = tpu.matmul %124, %125, %cst_48 {dimension_numbers = #tpu.dot_dimension_numbers<[1], [0], [0], [1], [0, 0, 1, 1], [], []>} : vector<64x64xbf16>, vector<64x64xbf16>, vector<64x64xf32> -> vector<64x64xf32>
    %127 = vector.extract_strided_slice %126 {offsets = [0, 0], sizes = [16, 64], strides = [1, 1]} : vector<64x64xf32> to vector<16x64xf32>
    %128 = vector.extract_strided_slice %126 {offsets = [16, 0], sizes = [16, 64], strides = [1, 1]} : vector<64x64xf32> to vector<16x64xf32>
    %129 = arith.addf %127, %128 : vector<16x64xf32>
    %130 = vector.extract_strided_slice %126 {offsets = [32, 0], sizes = [16, 64], strides = [1, 1]} : vector<64x64xf32> to vector<16x64xf32>
    %131 = arith.addf %129, %130 : vector<16x64xf32>
    %132 = vector.extract_strided_slice %126 {offsets = [48, 0], sizes = [16, 64], strides = [1, 1]} : vector<64x64xf32> to vector<16x64xf32>
    %133 = arith.addf %131, %132 : vector<16x64xf32>
    %134 = arith.addf %5, %133 : vector<16x64xf32>
    %c4 = arith.constant 4 : index
    %c0_49 = arith.constant 0 : index
    %135 = vector.load %arg3[%c4, %c0_49] : memref<8x384xf32, #tpu.memory_space<vmem>>, vector<1x64xf32>
    %136 = vector.broadcast %135 : vector<1x64xf32> to vector<16x64xf32>
    %137 = arith.addf %134, %136 : vector<16x64xf32>
    %c2 = arith.constant 2 : index
    %c0_50 = arith.constant 0 : index
    %138 = vector.load %arg3[%c2, %c0_50] : memref<8x384xf32, #tpu.memory_space<vmem>>, vector<1x64xf32>
    %c3 = arith.constant 3 : index
    %c0_51 = arith.constant 0 : index
    %139 = vector.load %arg3[%c3, %c0_51] : memref<8x384xf32, #tpu.memory_space<vmem>>, vector<1x64xf32>
    %cst_52 = arith.constant dense<0.000000e+00> : vector<16xf32>
    %140 = vector.multi_reduction <add>, %137, %cst_52 [1] : vector<16x64xf32> to vector<16xf32>
    %141 = vector.shape_cast %140 : vector<16xf32> to vector<16x1xf32>
    %cst_53 = arith.constant 6.400000e+01 : f32
    %142 = vector.broadcast %cst_53 : f32 to vector<16x1xf32>
    %143 = arith.divf %141, %142 : vector<16x1xf32>
    %144 = vector.broadcast %143 : vector<16x1xf32> to vector<16x64xf32>
    %145 = arith.subf %137, %144 : vector<16x64xf32>
    %146 = vector.broadcast %143 : vector<16x1xf32> to vector<16x64xf32>
    %147 = arith.subf %137, %146 : vector<16x64xf32>
    %148 = arith.mulf %145, %147 : vector<16x64xf32>
    %cst_54 = arith.constant dense<0.000000e+00> : vector<16xf32>
    %149 = vector.multi_reduction <add>, %148, %cst_54 [1] : vector<16x64xf32> to vector<16xf32>
    %150 = vector.shape_cast %149 : vector<16xf32> to vector<16x1xf32>
    %cst_55 = arith.constant 6.400000e+01 : f32
    %151 = vector.broadcast %cst_55 : f32 to vector<16x1xf32>
    %152 = arith.divf %150, %151 : vector<16x1xf32>
    %153 = vector.broadcast %143 : vector<16x1xf32> to vector<16x64xf32>
    %154 = arith.subf %137, %153 : vector<16x64xf32>
    %cst_56 = arith.constant 9.99999974E-6 : f32
    %155 = vector.broadcast %cst_56 : f32 to vector<16x1xf32>
    %156 = arith.addf %152, %155 : vector<16x1xf32>
    %157 = math.rsqrt %156 : vector<16x1xf32>
    %158 = vector.broadcast %157 : vector<16x1xf32> to vector<16x64xf32>
    %159 = arith.mulf %154, %158 : vector<16x64xf32>
    %160 = vector.broadcast %138 : vector<1x64xf32> to vector<16x64xf32>
    %161 = arith.mulf %159, %160 : vector<16x64xf32>
    %162 = vector.broadcast %139 : vector<1x64xf32> to vector<16x64xf32>
    %163 = arith.addf %161, %162 : vector<16x64xf32>
    %164 = arith.truncf %163 : vector<16x64xf32> to vector<16x64xbf16>
    %c0_57 = arith.constant 0 : index
    %c0_58 = arith.constant 0 : index
    %165 = vector.load %arg5[%c0_57, %c0_58] : memref<64x128xbf16, #tpu.memory_space<vmem>>, vector<64x128xbf16>
    %cst_59 = arith.constant dense<0.000000e+00> : vector<16x128xf32>
    %166 = tpu.matmul %164, %165, %cst_59 {dimension_numbers = #tpu.dot_dimension_numbers<[1], [0], [0], [1], [0, 0, 1, 1], [], []>} : vector<16x64xbf16>, vector<64x128xbf16>, vector<16x128xf32> -> vector<16x128xf32>
    %c6 = arith.constant 6 : index
    %c0_60 = arith.constant 0 : index
    %167 = vector.load %arg3[%c6, %c0_60] : memref<8x384xf32, #tpu.memory_space<vmem>>, vector<1x128xf32>
    %168 = vector.broadcast %167 : vector<1x128xf32> to vector<16x128xf32>
    %169 = arith.addf %166, %168 : vector<16x128xf32>
    %cst_61 = arith.constant 0.707106769 : f32
    %170 = vector.broadcast %cst_61 : f32 to vector<16x128xf32>
    %171 = arith.mulf %169, %170 : vector<16x128xf32>
    %cst_62 = arith.constant 0.000000e+00 : f32
    %172 = vector.broadcast %cst_62 : f32 to vector<16x128xf32>
    %173 = arith.cmpf oge, %171, %172 : vector<16x128xf32>
    %cst_63 = arith.constant 1.000000e+00 : f32
    %cst_64 = arith.constant -1.000000e+00 : f32
    %174 = vector.broadcast %cst_63 : f32 to vector<16x128xf32>
    %175 = vector.broadcast %cst_64 : f32 to vector<16x128xf32>
    %176 = arith.select %173, %174, %175 : vector<16x128xi1>, vector<16x128xf32>
    %177 = math.absf %171 : vector<16x128xf32>
    %cst_65 = arith.constant 0.327591091 : f32
    %178 = vector.broadcast %cst_65 : f32 to vector<16x128xf32>
    %179 = arith.mulf %178, %177 : vector<16x128xf32>
    %cst_66 = arith.constant 1.000000e+00 : f32
    %180 = vector.broadcast %cst_66 : f32 to vector<16x128xf32>
    %181 = arith.addf %180, %179 : vector<16x128xf32>
    %cst_67 = arith.constant 1.000000e+00 : f32
    %182 = vector.broadcast %cst_67 : f32 to vector<16x128xf32>
    %183 = arith.divf %182, %181 : vector<16x128xf32>
    %cst_68 = arith.constant 1.06140542 : f32
    %184 = vector.broadcast %cst_68 : f32 to vector<16x128xf32>
    %185 = arith.mulf %184, %183 : vector<16x128xf32>
    %cst_69 = arith.constant 1.45315206 : f32
    %186 = vector.broadcast %cst_69 : f32 to vector<16x128xf32>
    %187 = arith.subf %185, %186 : vector<16x128xf32>
    %188 = arith.mulf %187, %183 : vector<16x128xf32>
    %cst_70 = arith.constant 1.42141378 : f32
    %189 = vector.broadcast %cst_70 : f32 to vector<16x128xf32>
    %190 = arith.addf %188, %189 : vector<16x128xf32>
    %191 = arith.mulf %190, %183 : vector<16x128xf32>
    %cst_71 = arith.constant 0.284496725 : f32
    %192 = vector.broadcast %cst_71 : f32 to vector<16x128xf32>
    %193 = arith.subf %191, %192 : vector<16x128xf32>
    %194 = arith.mulf %193, %183 : vector<16x128xf32>
    %cst_72 = arith.constant 0.254829586 : f32
    %195 = vector.broadcast %cst_72 : f32 to vector<16x128xf32>
    %196 = arith.addf %194, %195 : vector<16x128xf32>
    %197 = arith.mulf %196, %183 : vector<16x128xf32>
    %cst_73 = arith.constant 0.000000e+00 : f32
    %198 = vector.broadcast %cst_73 : f32 to vector<16x128xf32>
    %199 = arith.subf %198, %177 : vector<16x128xf32>
    %200 = arith.mulf %199, %177 : vector<16x128xf32>
    %201 = math.exp %200 : vector<16x128xf32>
    %202 = arith.mulf %197, %201 : vector<16x128xf32>
    %cst_74 = arith.constant 1.000000e+00 : f32
    %203 = vector.broadcast %cst_74 : f32 to vector<16x128xf32>
    %204 = arith.subf %203, %202 : vector<16x128xf32>
    %205 = arith.mulf %176, %204 : vector<16x128xf32>
    %cst_75 = arith.constant 5.000000e-01 : f32
    %206 = vector.broadcast %cst_75 : f32 to vector<16x128xf32>
    %207 = arith.mulf %206, %169 : vector<16x128xf32>
    %cst_76 = arith.constant 1.000000e+00 : f32
    %208 = vector.broadcast %cst_76 : f32 to vector<16x128xf32>
    %209 = arith.addf %208, %205 : vector<16x128xf32>
    %210 = arith.mulf %207, %209 : vector<16x128xf32>
    %211 = arith.truncf %210 : vector<16x128xf32> to vector<16x128xbf16>
    %c0_77 = arith.constant 0 : index
    %c0_78 = arith.constant 0 : index
    %212 = vector.load %arg6[%c0_77, %c0_78] : memref<128x64xbf16, #tpu.memory_space<vmem>>, vector<128x64xbf16>
    %cst_79 = arith.constant dense<0.000000e+00> : vector<16x64xf32>
    %213 = tpu.matmul %211, %212, %cst_79 {dimension_numbers = #tpu.dot_dimension_numbers<[1], [0], [0], [1], [0, 0, 1, 1], [], []>} : vector<16x128xbf16>, vector<128x64xbf16>, vector<16x64xf32> -> vector<16x64xf32>
    %c5 = arith.constant 5 : index
    %c0_80 = arith.constant 0 : index
    %214 = vector.load %arg3[%c5, %c0_80] : memref<8x384xf32, #tpu.memory_space<vmem>>, vector<1x64xf32>
    %215 = vector.broadcast %214 : vector<1x64xf32> to vector<16x64xf32>
    %216 = arith.addf %213, %215 : vector<16x64xf32>
    %217 = arith.addf %137, %216 : vector<16x64xf32>
    %c0_81 = arith.constant 0 : index
    %c0_82 = arith.constant 0 : index
    %218 = vector.load %arg7[%c0_81, %c0_82] : memref<16x64xf32, #tpu.memory_space<vmem>>, vector<16x64xf32>
    tpu.vector_store %arg7[%c0_81, %c0_82], %217 {strides = array<i32>} : memref<16x64xf32, #tpu.memory_space<vmem>>, vector<16x64xf32>,
    return
  }
}

</mosaic_0001>

<bundles_post_ra>
// kernel: temporal_attention_forward.2
= control target key start
LH: loop header
LB: loop body
LE: loop exit
PB: predicated region body
PF: predicated region fallthrough
CT: control target
= control target key end

     0   :  { %v336_v0 = vmov 0.0   ;;  %vm337_vm0 = vmmov 0   ;;  %v338_v3 = vmov 0   ;;  %vm156_vm1 = vcmask 1041408   ;;  %s434_s0 = inlined_call_operand.vmem [shape: bf16[100,288], index: 0, kind: input, shape index: {}]   ;;  %s435_s2 = inlined_call_operand.vmem [shape: f32[8,1], index: 2, kind: input, shape index: {}]   ;;  %s436_s1 = inlined_call_operand.vmem [shape: bf16[8,100], index: 1, kind: input, shape index: {}]   ;;  %s437_s3 = inlined_call_operand.vmem [shape: f32[8,288], index: 3, kind: output, shape index: {}]  }
   0x1   :  { %287 = vmatprep.subr.bf16.mxu1 %v336_v0  ;;  %v309_v1 = vld [vmem:[%s434_s0 + $0x4] ss:$12 sps:$4 sm:$0xff]   ;;  %301 = vmatprep.mubr.msk.bf16.mxu1 %vm337_vm0, %v336_v0  ;;  %v311_v2 = vld [vmem:[%s434_s0 + $0x8] ss:$12 sps:$4 sm:$0xff]   ;;  %v312_v4 = vld [vmem:[%s434_s0] ss:$12 sps:$4 sm:$0xff]  }
   0x2   :  { %198 = vmatprep.mubr.bf16.mxu0 %v338_v3  ;;  %308 = vset.pattern.permute.xlu0 %v338_v3  ;;  %v313_v5 = vld [vmem:[%s434_s0 + $0x1c] ss:$12 sps:$4 sm:$0xff]   ;;  %v315_v6 = vld [vmem:[%s434_s0 + $0x20] ss:$12 sps:$4 sm:$0xff]   ;;  %v316_v7 = vld [vmem:[%s434_s0 + $0x18] ss:$12 sps:$4 sm:$0xff]  }
   0x3   :  { %166 = vmatprep.subr.bf16.mxu0 %v309_v1  ;;  %288 = vmatpush3.bf16.msra.mxu1 %v311_v2  ;;  %v317_v8 = vld [vmem:[%s434_s0 + $0x34] ss:$12 sps:$4 sm:$0xff]   ;;  %v319_v9 = vld [vmem:[%s434_s0 + $0x38] ss:$12 sps:$4 sm:$0xff]   ;;  %v320_v10 = vld [vmem:[%s434_s0 + $0x30] ss:$12 sps:$4 sm:$0xff]  }
   0x4   :  { %167 = vmatpush1.bf16.msra.mxu0 %v312_v4  ;;  %289 = vmatprep.subr.bf16.mxu1 %v336_v0  ;;  %v321_v11 = vld [vmem:[%s434_s0 + $0x4c] ss:$12 sps:$4 sm:$0xff]   ;;  %v323_v12 = vld [vmem:[%s434_s0 + $0x50] ss:$12 sps:$4 sm:$0xff]   ;;  %v324_v13 = vld [vmem:[%s434_s0 + $0x48] ss:$12 sps:$4 sm:$0xff]  }
   0x5   :  { %168 = vmatprep.subr.bf16.mxu0 %v313_v5  ;;  %v325_v14 = vld [vmem:[%s434_s0 + $0x64] ss:$12 sps:$4 sm:$0xff]   ;;  %v327_v15 = vld [vmem:[%s434_s0 + $0x68] ss:$12 sps:$4 sm:$0xff]   ;;  %v328_v17 = vld [vmem:[%s434_s0 + $0x60] ss:$12 sps:$4 sm:$0xff]  }
   0x6   :  { %v42_v16 = vld [vmem:[%s435_s2] sm:$0xff]  ;;  %v329_v18 = vld [vmem:[%s434_s0 + $0x7c] ss:$12 sps:$4 sm:$0xff]   ;;  %v40_v19 = vld [vmem:[%s434_s0 + $0x90] sm:$0x33]  ;;  %vm152_vm2 = vcmask 818176  }
   0x7   :  { %290 = vmatpush3.bf16.msra.mxu1 %v315_v6  ;;  %45 = vperm.xlu0 %308, %v42_v16   ;;  %v331_v20 = vld [vmem:[%s434_s0 + $0x80] ss:$12 sps:$4 sm:$0xff]   ;;  %v332_v21 = vld [vmem:[%s434_s0 + $0x78] ss:$12 sps:$4 sm:$0xff]   ;;  %v274_v23 = vcombine.high %v40_v19, %v40_v19  ;;  %v273_v24 = vcombine.low %v40_v19, %v40_v19  ;;  %vm249_vm3 = vcmask 261120  }
   0x8   :  { %169 = vmatpush1.bf16.msra.mxu0 %v316_v7  ;;  %291 = vmatprep.subr.bf16.mxu1 %v336_v0  ;;  %v334_v22 = vld [vmem:[%s434_s0 + $0x98] ss:$0 sps:$4 sm:$0x33]   ;;  %v15_v27 = vld [vmem:[%s436_s1] sm:$0xf] }
   0x9   :  { %170 = vmatprep.subr.bf16.mxu0 %v317_v8  ;;  %v164_v25 = vsel %vm156_vm1, %v334_v22, 0  ;;  %v158_v26 = vsel %vm156_vm1, %v273_v24, 0 }
   0xb   :  { %292 = vmatpush3.bf16.msra.mxu1 %v319_v9 }
   0xc   :  { %171 = vmatpush1.bf16.msra.mxu0 %v320_v10  ;;  %293 = vmatprep.subr.bf16.mxu1 %v336_v0 }
   0xd   :  { %172 = vmatprep.subr.bf16.mxu0 %v321_v11 }
   0xf   :  { %294 = vmatpush3.bf16.msra.mxu1 %v323_v12 }
  0x10   :  { %173 = vmatpush1.bf16.msra.mxu0 %v324_v13  ;;  %295 = vmatprep.subr.bf16.mxu1 %v336_v0 }
  0x11   :  { %174 = vmatprep.subr.bf16.mxu0 %v325_v14 }
  0x13   :  { %296 = vmatpush3.bf16.msra.mxu1 %v327_v15 }
  0x14   :  { %175 = vmatpush1.bf16.msra.mxu0 %v328_v17  ;;  %297 = vmatprep.subr.bf16.mxu1 %v336_v0 }
  0x15   :  { %176 = vmatprep.subr.bf16.mxu0 %v329_v18 }
  0x17   :  { %298 = vmatpush3.bf16.msra.mxu1 %v331_v20 }
  0x18   :  { %177 = vmatpush1.bf16.msra.mxu0 %v332_v21  ;;  %299 = vmatprep.subr.bf16.mxu1 %v336_v0 }
  0x19   :  { %276 = vmatprep.subr.msk.bf16.mxu0 %vm156_vm1, %v274_v23 }
  0x1b   :  { %300 = vmatpush3.bf16.msra.mxu1 %v164_v25 }
  0x1c   :  { %179 = vmatpush1.bf16.msra.mxu0 %v158_v26 }
  0x1e   :  { %302 = vmatmul.mubr.msk.bf16.vlgmr.msra.gmra.mrb[0].mxu1 %vm152_vm2, %v15_v27 }
  0x1f   :  { %277 = vmatmul.mubr.msk.bf16.vlgmr.msra.gmra.mrb[0].mxu0 %vm152_vm2, %v15_v27 }
  0x86   :  { %v46_v28 = vpop.permute.xlu0 %45 }
  0xf1   :  { %v241_v29 = vpop.f32.mrb[0].mxu1 }
  0xf2   :  { %v242_v30 = vadd.f32 %v241_v29, %v46_v28  ;;  %v200_v31 = vpop.f32.mrb[0].mxu0  ;;  %v303_v32 = vpop.f32.mrb[1].mxu1 }
  0xf3   :  { %v201_v33 = vadd.f32 %v200_v31, %v46_v28  ;;  %v202_v34 = vpop.f32.mrb[1].mxu0  ;;  %v244_v35 = vpop.f32.mrb[2].mxu1 }
  0xf4   :  { %250 = vst.msk [vmem:[%s437_s3 + $0x10] sm:$0xff] %vm249_vm3, %v242_v30  ;;  %v203_v36 = vadd.f32 %v202_v34, %v46_v28  ;;  %v204_v37 = vpop.f32.mrb[2].mxu0  ;;  %v304_v38 = vpop.f32.mrb[3].mxu1 }
  0xf5   :  { %247 = vst [vmem:[%s437_s3] sm:$0xff] %v201_v33  ;;  %v205_v39 = vpop.f32.mrb[3].mxu0 }
  0xf6   :  { %248 = vst [vmem:[%s437_s3 + $0x8] sm:$0xff] %v203_v36 }

// kernel: tile.8
= control target key start
LH: loop header
LB: loop body
LE: loop exit
PB: predicated region body
PF: predicated region fallthrough
CT: control target
= control target key end

     0   :  { %s22_s0 = inlined_call_operand.vmem [shape: f32[8], index: 0, kind: input, shape index: {}]   ;;  %s23_s1 = inlined_call_operand.vmem [shape: f32[2,8], index: 1, kind: output, shape index: {}]  }
   0x1   :  { %v4_v0 = vld [vmem:[%s22_s0] ss:$0 sm:$0xff] }
   0x2   :  { %5 = vst [vmem:[%s23_s1] sm:$0x3] %v4_v0 }

// kernel: tile.0
= control target key start
LH: loop header
LB: loop body
LE: loop exit
PB: predicated region body
PF: predicated region fallthrough
CT: control target
= control target key end

     0   :  { %s66_s8 = smov 125   ;;  %vm7_vm0 = vcmask 7168   ;;  %s67_s11 = smov 126   ;;  %s117_s0 = inlined_call_operand.vmem [shape: f32[2,8], index: 0, kind: input, shape index: {}]   ;;  %s118_s1 = inlined_call_operand.vmem [shape: f32[16,1], index: 1, kind: output, shape index: {}]  }
   0x1   :  { %v4_v0 = vld [vmem:[%s117_s0] sm:$0x3]  ;;  %s65_s0 = smov 127   ;;  %s68_s12 = smov 124  }
   0x2   :  { %5 = vst [vmem:[#allocation0] sm:$0x3] %v4_v0  ;;  %s69_s13 = smov 123   ;;  %s70_s14 = smov 122  }
   0x3   :  { %s71_s15 = smov 121  }
   0x9   :  { %v9_v1 = vld [vmem:[#allocation0] sm:$0x3]  }
   0xa   :  { %v21_v2 = vld [vmem:[#allocation0] sm:$0x3]   ;;  %10 = vrot.lane.b32.xlu0 %v9_v1, %s65_s0 }
   0xb   :  { %22 = vrot.lane.b32.xlu1 %v21_v2, %s66_s8  ;;  %v15_v3 = vld [vmem:[#allocation0] sm:$0x3]  }
   0xc   :  { %v27_v4 = vld [vmem:[#allocation0] sm:$0x3]  }
   0xd   :  { %v6_v5 = vld [vmem:[#allocation0] sm:$0x3]  }
   0xe   :  { %8 = vst.msk [vmem:[%s118_s1] ss:$8 sm:$0x3] %vm7_vm0, %v6_v5   ;;  %16 = vrot.lane.b32.xlu0 %v15_v3, %s67_s11  ;;  %v33_v6 = vld [vmem:[#allocation0] sm:$0x3]  }
   0xf   :  { %28 = vrot.lane.b32.xlu1 %v27_v4, %s68_s12  ;;  %v39_v7 = vld [vmem:[#allocation0] sm:$0x3]  }
  0x10   :  { %v45_v8 = vld [vmem:[#allocation0] sm:$0x3]  }
  0x12   :  { %34 = vrot.lane.b32.xlu0 %v33_v6, %s69_s13 }
  0x13   :  { %40 = vrot.lane.b32.xlu1 %v39_v7, %s70_s14 }
  0x16   :  { %46 = vrot.lane.b32.xlu0 %v45_v8, %s71_s15 }
  0x7c   :  { %v11_v9 = vpop.permute.xlu0 %10  }
  0x7d   :  { %v23_v10 = vpop.permute.xlu1 %22   ;;  %51 = vst.msk [vmem:[%s118_s1 + $0x1] ss:$8 sm:$0x3] %vm7_vm0, %v11_v9  }
  0x7e   :  { %53 = vst.msk [vmem:[%s118_s1 + $0x3] ss:$8 sm:$0x3] %vm7_vm0, %v23_v10  }
  0x80   :  { %v17_v11 = vpop.permute.xlu0 %16  }
  0x81   :  { %v29_v12 = vpop.permute.xlu1 %28   ;;  %52 = vst.msk [vmem:[%s118_s1 + $0x2] ss:$8 sm:$0x3] %vm7_vm0, %v17_v11  }
  0x82   :  { %54 = vst.msk [vmem:[%s118_s1 + $0x4] ss:$8 sm:$0x3] %vm7_vm0, %v29_v12  }
  0x84   :  { %v35_v13 = vpop.permute.xlu0 %34  }
  0x85   :  { %v41_v14 = vpop.permute.xlu1 %40   ;;  %55 = vst.msk [vmem:[%s118_s1 + $0x5] ss:$8 sm:$0x3] %vm7_vm0, %v35_v13  }
  0x86   :  { %56 = vst.msk [vmem:[%s118_s1 + $0x6] ss:$8 sm:$0x3] %vm7_vm0, %v41_v14  }
  0x88   :  { %v47_v15 = vpop.permute.xlu0 %46  }
  0x89   :  { %57 = vst.msk [vmem:[%s118_s1 + $0x7] ss:$8 sm:$0x3] %vm7_vm0, %v47_v15  }

// kernel: temporal_attention_forward.3
= control target key start
LH: loop header
LB: loop body
LE: loop exit
PB: predicated region body
PF: predicated region fallthrough
CT: control target
= control target key end

     0   :  { %v1768_v0 = vmov 0   ;;  %vm262_vm0 = vcmask 130048   ;;  %vm350_vm1 = vcmask 523264   ;;  %vm1770_vm2 = vmmov 0   ;;  %s1772_s18 = smov 96   ;;  %s1773_s19 = smov 80   ;;  %s2231_s0 = inlined_call_operand.vmem [shape: bf16[400,64], index: 0, kind: input, shape index: {}]   ;;  %s2232_s1 = inlined_call_operand.vmem [shape: bf16[16,400], index: 1, kind: input, shape index: {}]   ;;  %s2233_s2 = inlined_call_operand.vmem [shape: f32[16,1], index: 2, kind: input, shape index: {}]   ;;  %s2234_s4 = inlined_call_operand.vmem [shape: bf16[64,384], index: 4, kind: input, shape index: {}]   ;;  %s2235_s3 = inlined_call_operand.vmem [shape: f32[8,384], index: 3, kind: input, shape index: {}]   ;;  %s2236_s5 = inlined_call_operand.vmem [shape: bf16[64,128], index: 5, kind: input, shape index: {}]   ;;  %s2237_s6 = inlined_call_operand.vmem [shape: bf16[128,64], index: 6, kind: input, shape index: {}]   ;;  %s2238_s7 = inlined_call_operand.vmem [shape: f32[16,64], index: 7, kind: output, shape index: {}]  }
   0x1   :  { %307 = vmatprep.subr.bf16.mxu1 %v1768_v0  ;;  %v1661_v1 = vld [vmem:[%s2231_s0 + $0x40] sm:$0xff]   ;;  %1635 = vset.pattern.permute.xlu0 %v1768_v0  ;;  %v1664_v4 = vld [vmem:[%s2231_s0 + $0x48] sm:$0xff]   ;;  %v1667_v7 = vld [vmem:[%s2231_s0 + $0x50] sm:$0xff]   ;;  %s1774_s20 = smov 64  }
   0x2   :  { %v1662_v2 = vld [vmem:[%s2231_s0 + $0x80] sm:$0xff]   ;;  %1490 = vmatprep.subr.bf16.mxu0 %v1661_v1  ;;  %v1665_v5 = vld [vmem:[%s2231_s0 + $0x88] sm:$0xff]   ;;  %v1668_v8 = vld [vmem:[%s2231_s0 + $0x90] sm:$0xff]  }
   0x3   :  { %v1663_v3 = vld [vmem:[%s2231_s0] sm:$0xff]   ;;  %308 = vmatpush1.bf16.msra.mxu1 %v1662_v2  ;;  %v1666_v6 = vld [vmem:[%s2231_s0 + $0x8] sm:$0xff]   ;;  %v1669_v9 = vld [vmem:[%s2231_s0 + $0x10] sm:$0xff]  }
   0x4   :  { %1491 = vmatpush3.bf16.msra.mxu0 %v1663_v3  ;;  %309 = vmatprep.subr.bf16.mxu1 %v1768_v0  ;;  %v1670_v10 = vld [vmem:[%s2231_s0 + $0x58] sm:$0xff]   ;;  %v1673_v13 = vld [vmem:[%s2231_s0 + $0x60] sm:$0xff]   ;;  %v1676_v16 = vld [vmem:[%s2231_s0 + $0x68] sm:$0xff]  }
   0x5   :  { %1492 = vmatprep.subr.bf16.mxu0 %v1664_v4  ;;  %v1671_v11 = vld [vmem:[%s2231_s0 + $0x98] sm:$0xff]   ;;  %v1674_v14 = vld [vmem:[%s2231_s0 + $0xa0] sm:$0xff]   ;;  %v1677_v17 = vld [vmem:[%s2231_s0 + $0xa8] sm:$0xff]   ;;  %v1769_v4 = vmov 0.0  }
   0x6   :  { %v1672_v12 = vld [vmem:[%s2231_s0 + $0x18] sm:$0xff]   ;;  %v1675_v15 = vld [vmem:[%s2231_s0 + $0x20] sm:$0xff]   ;;  %v1678_v18 = vld [vmem:[%s2231_s0 + $0x28] sm:$0xff]  }
   0x7   :  { %310 = vmatpush1.bf16.msra.mxu1 %v1665_v5  ;;  %v1679_v19 = vld [vmem:[%s2231_s0 + $0x70] sm:$0xff]   ;;  %v1682_v22 = vld [vmem:[%s2231_s0 + $0x78] sm:$0xff]   ;;  %v81_v26 = vld [vmem:[%s2233_s2] sm:$0xff] }
   0x8   :  { %1493 = vmatpush3.bf16.msra.mxu0 %v1666_v6  ;;  %311 = vmatprep.subr.bf16.mxu1 %v1768_v0  ;;  %v1680_v20 = vld [vmem:[%s2231_s0 + $0xb0] sm:$0xff]   ;;  %v1683_v24 = vld [vmem:[%s2231_s0 + $0xb8] sm:$0xff]   ;;  %v1688_v29 = vld [vmem:[%s2231_s0 + $0xc0] sm:$0xff]  }
   0x9   :  { %1494 = vmatprep.subr.bf16.mxu0 %v1667_v7  ;;  %v1681_v21 = vld [vmem:[%s2231_s0 + $0x30] sm:$0xff]   ;;  %v1691_v25 = vld [vmem:[%s2232_s1 + $0xc] ss:$16 sps:$4 sm:$0xff]   ;;  %85 = vperm.xlu0 %1635, %v81_v26   ;;  %v1689_v31 = vld [vmem:[%s2232_s1 + $0x8] ss:$16 sps:$4 sm:$0xff]   ;;  %v402_v26 = vlaneseq }
   0xa   :  { %v1687_v23 = vld [vmem:[%s2232_s1 + $0x4] ss:$16 sps:$4 sm:$0xff]   ;;  %v1684_v27 = vld [vmem:[%s2231_s0 + $0x38] sm:$0xff]   ;;  %1449 = vmatprep.mubr.msk.bf16.mxu1 %vm262_vm0, %v1691_v25  ;;  %v1685_v28 = vld [vmem:[%s2232_s1] ss:$16 sps:$4 sm:$0xff]  }
   0xb   :  { %312 = vmatpush1.bf16.msra.mxu1 %v1668_v8  ;;  %298 = vmatprep.mubr.bf16.mxu0 %v1687_v23  ;;  %v82_v30 = vld [vmem:[%s2233_s2 + $0x8] sm:$0xff]  ;;  %v1694_v60 = vld [vmem:[%s2234_s4 + $0x4] ss:$12 sps:$4 sm:$0xff]  }
   0xc   :  { %1495 = vmatpush3.bf16.msra.mxu0 %v1669_v9  ;;  %313 = vmatprep.subr.bf16.mxu1 %v1768_v0  ;;  %v1692_v61 = vld [vmem:[%s2234_s4] ss:$12 sps:$4 sm:$0xff]   ;;  %v1697_v62 = vld [vmem:[%s2234_s4 + $0x1c] ss:$12 sps:$4 sm:$0xff]   ;;  %v1695_v63 = vld [vmem:[%s2234_s4 + $0x18] ss:$12 sps:$4 sm:$0xff]  }
   0xd   :  { %1496 = vmatprep.subr.bf16.mxu0 %v1670_v10  ;;  %90 = vperm.xlu0 %1635, %v82_v30   ;;  %v1698_v1 = vld [vmem:[%s2234_s4 + $0x30] ss:$12 sps:$4 sm:$0xff]   ;;  %v1703_v2 = vld [vmem:[%s2234_s4 + $0x4c] ss:$12 sps:$4 sm:$0xff]   ;;  %v1701_v3 = vld [vmem:[%s2234_s4 + $0x48] ss:$12 sps:$4 sm:$0xff]  }
   0xe   :  { %v1705_v23 = vld [vmem:[%s2234_s4 + $0x20] ss:$12 sps:$4 sm:$0xff]   ;;  %v1707_v25 = vld [vmem:[%s2234_s4 + $0x50] ss:$12 sps:$4 sm:$0xff]  }
   0xf   :  { %314 = vmatpush1.bf16.msra.mxu1 %v1671_v11 }
  0x10   :  { %1497 = vmatpush3.bf16.msra.mxu0 %v1672_v12  ;;  %315 = vmatprep.subr.bf16.mxu1 %v1768_v0 }
  0x11   :  { %1498 = vmatprep.subr.bf16.mxu0 %v1673_v13  ;;  %v348_v13 = vld [vmem:[%s2235_s3] ss:$0 sm:$0xff] }
  0x13   :  { %316 = vmatpush1.bf16.msra.mxu1 %v1674_v14 }
  0x14   :  { %1499 = vmatpush3.bf16.msra.mxu0 %v1675_v15  ;;  %317 = vmatprep.subr.bf16.mxu1 %v1768_v0 }
  0x15   :  { %1500 = vmatprep.subr.bf16.mxu0 %v1676_v16 }
  0x17   :  { %318 = vmatpush1.bf16.msra.mxu1 %v1677_v17  ;;  %v349_v17 = vld [vmem:[%s2235_s3 + $0x1] ss:$0 sm:$0xff] }
  0x18   :  { %1501 = vmatpush3.bf16.msra.mxu0 %v1678_v18  ;;  %319 = vmatprep.subr.bf16.mxu1 %v1768_v0 }
  0x19   :  { %1502 = vmatprep.subr.bf16.mxu0 %v1679_v19 }
  0x1b   :  { %320 = vmatpush1.bf16.msra.mxu1 %v1680_v20 }
  0x1c   :  { %1503 = vmatpush3.bf16.msra.mxu0 %v1681_v21  ;;  %321 = vmatprep.subr.bf16.mxu1 %v1768_v0  ;;  %v1704_v21 = vld [vmem:[%s2234_s4 + $0x8] ss:$12 sps:$4 sm:$0xff]  }
  0x1d   :  { %1504 = vmatprep.subr.bf16.mxu0 %v1682_v22 }
  0x1f   :  { %322 = vmatpush1.bf16.msra.mxu1 %v1683_v24  ;;  %v1706_v24 = vld [vmem:[%s2234_s4 + $0x38] ss:$12 sps:$4 sm:$0xff]  }
  0x20   :  { %1505 = vmatpush3.bf16.msra.mxu0 %v1684_v27  ;;  %323 = vmatprep.subr.bf16.mxu1 %v1768_v0  ;;  %v1984_v27 = vshrl.u32 %v402_v26, 7 }
  0x22   :  { %v408_v30 = vsub.s32 1, %v1984_v27 }
  0x23   :  { %299 = vmatmul.mubr.bf16.vlgmr.msra.gmra.mrb[0].mxu0 %v1685_v28  ;;  %324 = vmatpush1.bf16.msra.mxu1 %v1688_v29  ;;  %v404_v28 = vsub.s32 0, %v1984_v27  ;;  %v1450_v29 = vld [vmem:[%s2235_s3 + $0x7] ss:$8 sm:$0x7] }
  0x24   :  { %484 = vmatprep.subr.bf16.mxu1 %v1694_v60 }
  0x26   :  { %340 = vmatmul.mubr.bf16.vlgmr.msra.gmra.mrb[0].mxu1 %v1689_v31  ;;  %v405_v31 = vrot.slane %v1450_v29, %v404_v28  ;;  %v727_v28 = vadd.s32 40, %v1984_v27 }
  0x27   :  { %516 = vmatprep.mubr.bf16.mxu1 %v1768_v0  ;;  %485 = vmatpush1.bf16.msra.mxu1 %v1692_v61  ;;  %v1700_v0 = vld [vmem:[%s2234_s4 + $0x34] ss:$12 sps:$4 sm:$0xff]   ;;  %s1771_s4 = smov 112  }
  0x28   :  { %486 = vmatprep.subr.bf16.mxu1 %v1697_v62 }
  0x2b   :  { %487 = vmatpush1.bf16.msra.mxu1 %v1695_v63 }
  0x2c   :  { %488 = vmatprep.subr.bf16.mxu1 %v1700_v0 }
  0x2f   :  { %489 = vmatpush1.bf16.msra.mxu1 %v1698_v1 }
  0x30   :  { %490 = vmatprep.subr.bf16.mxu1 %v1703_v2 }
  0x33   :  { %491 = vmatpush1.bf16.msra.mxu1 %v1701_v3 }
  0x34   :  { %1547 = vmatprep.subr.bf16.mxu1 %v1769_v4 }
  0x88   :  { %v86_v32 = vpop.permute.xlu0 %85 }
  0x8c   :  { %v91_v42 = vpop.permute.xlu0 %90 }
  0xf6   :  { %v1506_v33 = vpop.f32.mrb[0].mxu0 }
  0xf7   :  { %v1507_v34 = vpop.f32.mrb[1].mxu0 }
  0xf8   :  { %v1508_v35 = vadd.f32 %v1507_v34, %v1506_v33  ;;  %v1509_v36 = vpop.f32.mrb[2].mxu0  ;;  %v409_v33 = vrot.slane %v1450_v29, %v408_v30 }
  0xf9   :  { %v1510_v37 = vpop.f32.mrb[3].mxu0  ;;  %v341_v38 = vpop.f32.mrb[0].mxu1 }
  0xfa   :  { %v1511_v39 = vadd.f32 %v1510_v37, %v1509_v36  ;;  %v301_v40 = vadd.f32 %v1508_v35, %v86_v32  ;;  %v343_v41 = vpop.f32.mrb[1].mxu1 }
  0xfb   :  { %v344_v43 = vpop.f32.mrb[2].mxu1 }
  0xfc   :  { %v1921_v44 = vadd.f32 %v341_v38, %v301_v40  ;;  %v304_v45 = vadd.f32 %v1511_v39, %v91_v42  ;;  %v346_v46 = vpop.f32.mrb[3].mxu1 }
  0xfd   :  { %v412_v46 = vsub.s32 2, %v1984_v27 }
  0xfe   :  { %v1923_v47 = vadd.f32 %v344_v43, %v304_v45  ;;  %v351_v48 = vsel %vm350_vm1, %v1921_v44, 0.0 }
  0xff   :  { %352 = vadd.xlane.f32.xlu1 %v351_v48  ;;  %v413_v48 = vrot.slane %v1450_v29, %v412_v46 }
 0x100   :  { %v354_v49 = vsel %vm350_vm1, %v1923_v47, 0.0 }
 0x103   :  { %355 = vadd.xlane.f32.xlu1 %v354_v49 }
 0x18c   :  { %v353_v50 = vpop.xlane.xlu1 %352 }
 0x18d   :  { %v358_v51 = vmul.f32 0.015625, %v353_v50 }
 0x18f   :  { %v360_v52 = vsub.f32 %v1921_v44, %v358_v51 }
 0x190   :  { %v356_v53 = vpop.xlane.xlu1 %355 }
 0x191   :  { %v359_v54 = vmul.f32 0.015625, %v356_v53  ;;  %v362_v55 = vmul.f32 %v360_v52, %v360_v52 }
 0x193   :  { %v361_v56 = vsub.f32 %v1923_v47, %v359_v54  ;;  %v364_v57 = vsel %vm350_vm1, %v362_v55, 0.0 }
 0x194   :  { %365 = vadd.xlane.f32.xlu0 %v364_v57 }
 0x195   :  { %v363_v58 = vmul.f32 %v361_v56, %v361_v56 }
 0x197   :  { %v367_v59 = vsel %vm350_vm1, %v363_v58, 0.0 }
 0x198   :  { %368 = vadd.xlane.f32.xlu1 %v367_v59 }
 0x221   :  { %v366_v5 = vpop.xlane.xlu0 %365 }
 0x222   :  { %v370_v6 = vmul.f32 0.015625, %v366_v5 }
 0x224   :  { %v372_v7 = vadd.f32 1e-05, %v370_v6 }
 0x225   :  { %v369_v8 = vpop.xlane.xlu1 %368 }
 0x226   :  { %1720 = vrsqrt.f32 %v372_v7  ;;  %v371_v9 = vmul.f32 0.015625, %v369_v8 }
 0x228   :  { %v373_v10 = vadd.f32 1e-05, %v371_v9 }
 0x22a   :  { %1722 = vrsqrt.f32 %v373_v10 }
 0x230   :  { %v1721_v11 = vpop.eup %1720 }
 0x231   :  { %v376_v12 = vmul.f32 %v1721_v11, %v360_v52 }
 0x233   :  { %v378_v15 = vmul.f32 %v376_v12, %v348_v13 }
 0x234   :  { %v1723_v14 = vpop.eup %1722 }
 0x235   :  { %v377_v16 = vmul.f32 %v1723_v14, %v361_v56  ;;  %v380_v19 = vadd.f32 %v378_v15, %v349_v17  ;;  %v731_v14 = vand.u32 127, %v402_v26  ;;  %v724_v15 = vadd.s32 16, %v1984_v27 }
 0x236   :  { %v728_v26 = vadd.s32 48, %v1984_v27 }
 0x237   :  { %v379_v18 = vmul.f32 %v377_v16, %v348_v13  ;;  %v723_v16 = vadd.s32 8, %v1984_v27  ;;  %vm798_vm3 = vcmp.ge.s32.totalorder %v731_v14, 16  ;;  %vm807_vm4 = vcmp.lt.s32.totalorder %v731_v14, 32 }
 0x238   :  { %vm765_vm5 = vcmp.lt.s32.totalorder %v731_v14, 16  ;;  %vm2035_vm7 = vmand %vm798_vm3, %vm807_vm4  ;;  %vm848_vm14 = vcmp.ge.s32.totalorder %v731_v14, 32  ;;  %vm857_vm15 = vcmp.lt.s32.totalorder %v731_v14, 48  ;;  %vm907_vm3 = vcmp.lt.s32.totalorder %v731_v14, 64 }
 0x239   :  { %v381_v20 = vadd.f32 %v379_v18, %v349_v17  ;;  %v932_v17 = vand.u32 1, %v731_v14  ;;  %v924_v18 = vand.u32 1, %v1984_v27 }
 0x23b   :  { %v382_v22 = vpack.c.bf16 %v381_v20, %v380_v19  ;;  %v725_v19 = vadd.s32 24, %v1984_v27  ;;  %v926_v20 = vand.u32 1, %v724_v15  ;;  %vm933_vm6 = vcmp.eq.s32.totalorder %v924_v18, %v932_v17 }
 0x23c   :  { %vm941_vm10 = vmand %vm765_vm5, %vm933_vm6 }
 0x23d   :  { %1463 = vmatmul.mubr.msk.bf16.vlgmr.msra.gmra.mrb[4].mxu1 %vm350_vm1, %v382_v22  ;;  %vm2039_vm8 = vcmp.eq.s32.totalorder %v926_v20, %v932_v17 }
 0x23e   :  { %1548 = vmatpush3.bf16.msra.mxu1 %v1704_v21  ;;  %1555 = vmatprep.mubr.msk.bf16.mxu1 %vm1770_vm2, %v1769_v4  ;;  %v925_v21 = vand.u32 1, %v723_v16  ;;  %vm943_vm11 = vmand %vm2035_vm7, %vm2039_vm8 }
 0x23f   :  { %1549 = vmatprep.subr.bf16.mxu1 %v1769_v4 }
 0x240   :  { %vm934_vm9 = vcmp.eq.s32.totalorder %v925_v21, %v932_v17 }
 0x241   :  { %vm942_vm13 = vmand %vm765_vm5, %vm934_vm9 }
 0x242   :  { %1550 = vmatpush3.bf16.msra.mxu1 %v1705_v23  ;;  %v726_v23 = vadd.s32 32, %v1984_v27  ;;  %vm2066_vm5 = vmand %vm848_vm14, %vm857_vm15 }
 0x243   :  { %1551 = vmatprep.subr.bf16.mxu1 %v1769_v4 }
 0x246   :  { %1552 = vmatpush3.bf16.msra.mxu1 %v1706_v24 }
 0x247   :  { %1553 = vmatprep.subr.bf16.mxu1 %v1769_v4 }
 0x24a   :  { %1554 = vmatpush3.bf16.msra.mxu1 %v1707_v25 }
 0x24d   :  { %1556 = vmatmul.mubr.msk.bf16.vlgmr.msra.gmra.mrb[8].mxu1 %vm350_vm1, %v382_v22  ;;  %v927_v22 = vand.u32 1, %v725_v19 }
 0x24f   :  { %vm2050_vm12 = vcmp.eq.s32.totalorder %v927_v22, %v932_v17 }
 0x250   :  { %vm944_vm4 = vmand %vm2035_vm7, %vm2050_vm12 }
 0x310   :  { %v518_v32 = vpop.f32.mrb[4].mxu1 }
 0x311   :  { %v520_v34 = vpop.f32.mrb[5].mxu1  ;;  %v519_v36 = vadd.f32 %v518_v32, %v405_v31 }
 0x312   :  { %v522_v35 = vpop.f32.mrb[6].mxu1  ;;  %v1991_v39 = vadd.f32 %v520_v34, %v409_v33  ;;  %v729_v34 = vadd.s32 56, %v1984_v27 }
 0x313   :  { %v523_v37 = vadd.f32 %v522_v35, %v405_v31  ;;  %v524_v38 = vpop.f32.mrb[7].mxu1  ;;  %v928_v31 = vand.u32 1, %v726_v23 }
 0x314   :  { %v1993_v40 = vadd.f32 %v524_v38, %v409_v33  ;;  %v930_v33 = vand.u32 1, %v728_v26 }
 0x315   :  { %v1636_v41 = vpack.i.bf16 %v523_v37, %v519_v36  ;;  %v616_v42 = vpack.c.bf16 %v523_v37, %v519_v36  ;;  %v929_v37 = vand.u32 1, %v727_v28  ;;  %vm2070_vm6 = vcmp.eq.s32.totalorder %v928_v31, %v932_v17 }
 0x316   :  { %v1651_v43 = vpack.i.bf16 %v1993_v40, %v1991_v39  ;;  %v1049_v45 = vpack.c.bf16 %v1993_v40, %v1991_v39 }
 0x317   :  { %1637 = vrot.lane.b32.xlu1 %v1636_v41, %s1771_s4  ;;  %1567 = vmatprep.mubr.msk.bf16.mxu0 %vm262_vm0, %v616_v42  ;;  %vm2083_vm8 = vcmp.eq.s32.totalorder %v929_v37, %v932_v17 }
 0x318   :  { %1575 = vmatprep.subr.bf16.mxu1 %v1049_v45  ;;  %vm946_vm14 = vmand %vm2066_vm5, %vm2083_vm8 }
 0x319   :  { %1576 = vmatpush3.bf16.msra.mxu1 %v1049_v45 }
 0x31b   :  { %1642 = vrot.lane.b32.xlu1 %v1636_v41, %s1772_s18 }
 0x31f   :  { %1647 = vrot.lane.b32.xlu1 %v1636_v41, %s1773_s19 }
 0x320   :  { %v561_v49 = vpop.f32.mrb[8].mxu1 }
 0x321   :  { %v1557_v50 = vpop.f32.mrb[9].mxu1  ;;  %v2001_v52 = vadd.f32 %v561_v49, %v413_v48 }
 0x322   :  { %v564_v51 = vpop.f32.mrb[10].mxu1 }
 0x323   :  { %v2003_v53 = vadd.f32 %v564_v51, %v413_v48  ;;  %v1558_v54 = vpop.f32.mrb[11].mxu1  ;;  %624 = vrot.lane.b32.xlu1 %v616_v42, %s1774_s20  ;;  %v931_v51 = vand.u32 1, %v729_v34 }
 0x325   :  { %v1656_v55 = vpack.i.bf16 %v2003_v53, %v2001_v52  ;;  %v2010_v56 = vpack.c.bf16 %v2003_v53, %v2001_v52  ;;  %vm940_vm15 = vcmp.eq.s32.totalorder %v931_v51, %v932_v17 }
 0x389   :  { %v1638_v57 = vpop.permute.xlu1 %1637 }
 0x38a   :  { %v1640_v58 = vunpack.i.h.bf16 %v1638_v57  ;;  %v1639_v59 = vunpack.i.l.bf16 %v1638_v57 }
 0x38c   :  { %v617_v60 = vpack.c.bf16 %v1640_v58, %v1639_v59 }
 0x38d   :  { %v1643_v61 = vpop.permute.xlu1 %1642 }
 0x38e   :  { %v1645_v62 = vunpack.i.h.bf16 %v1643_v61  ;;  %v1644_v63 = vunpack.i.l.bf16 %v1643_v61  ;;  %626 = vrot.lane.b32.xlu0 %v617_v60, %s1774_s20 }
 0x390   :  { %v618_v0 = vpack.c.bf16 %v1645_v62, %v1644_v63 }
 0x391   :  { %v1648_v1 = vpop.permute.xlu1 %1647 }
 0x392   :  { %v1650_v2 = vunpack.i.h.bf16 %v1648_v1  ;;  %v1649_v3 = vunpack.i.l.bf16 %v1648_v1  ;;  %628 = vrot.lane.b32.xlu1 %v618_v0, %s1774_s20 }
 0x394   :  { %v619_v5 = vpack.c.bf16 %v1650_v2, %v1649_v3 }
 0x395   :  { %v625_v6 = vpop.permute.xlu1 %624 }
 0x396   :  { %v645_v7 = vsel %vm262_vm0, %v625_v6, 0  ;;  %630 = vrot.lane.b32.xlu1 %v619_v5, %s1774_s20  ;;  %1623 = vmatprep.subr.msk.bf16.mxu0 %vm262_vm0, %v625_v6 }
 0x397   :  { %1560 = vmatpush3.bf16.xpose.msra.mxu0 %v645_v7 }
 0x400   :  { %v627_v8 = vpop.permute.xlu0 %626 }
 0x401   :  { %v648_v9 = vsel %vm262_vm0, %v627_v8, 0  ;;  %1624 = vmatprep.subr.msk.bf16.mxu0 %vm262_vm0, %v627_v8 }
 0x402   :  { %1562 = vmatpush3.bf16.xpose.msra.mxu0 %v648_v9 }
 0x404   :  { %v629_v10 = vpop.permute.xlu1 %628 }
 0x405   :  { %1625 = vmatprep.subr.msk.bf16.mxu0 %vm262_vm0, %v629_v10  ;;  %v651_v11 = vsel %vm262_vm0, %v629_v10, 0 }
 0x408   :  { %v631_v12 = vpop.permute.xlu1 %630 }
 0x409   :  { %v654_v13 = vsel %vm262_vm0, %v631_v12, 0 }
 0x40a   :  { %1564 = vmatpush3.bf16.xpose.msra.mxu0 %v651_v11 }
 0x40b   :  { %1626 = vmatprep.subr.msk.bf16.mxu0 %vm262_vm0, %v631_v12 }
 0x412   :  { %1566 = vmatpush3.bf16.xpose.msra.mxu0 %v654_v13 }
 0x413   :  { %1603 = vmatprep.subr.bf16.mxu0 %v1769_v4 }
 0x419   :  { %1568 = vmatmul.mubr.msk.bf16.vlgmr.msra.gmra.mrb[4].mxu0 %vm262_vm0, %v617_v60 }
 0x41a   :  { %1571 = vmatprep.mubr.msk.bf16.mxu0 %vm262_vm0, %v618_v0 }
 0x421   :  { %1572 = vmatmul.mubr.msk.bf16.gmra.mrb[8].mxu0 %vm262_vm0, %v619_v5  ;;  %vm898_vm0 = vcmp.ge.s32.totalorder %v731_v14, 48 }
 0x422   :  { %1619 = vmatprep.mubr.msk.bf16.mxu0 %vm1770_vm2, %v1769_v4  ;;  %vm2075_vm9 = vmand %vm898_vm0, %vm907_vm3 }
 0x423   :  { %vm948_vm7 = vmand %vm2075_vm9, %vm940_vm15 }
 0x4ec   :  { %v1569_v29 = vpop.f32.mrb[4].mxu0 }
 0x4ed   :  { %v690_v32 = vpop.f32.mrb[5].mxu0  ;;  %v951_v42 = vsel %vm943_vm11, %v1569_v29, -1e+30  ;;  %vm945_vm11 = vmand %vm2066_vm5, %vm2070_vm6 }
 0x4ee   :  { %v949_v35 = vsel %vm941_vm10, %v690_v32, -1e+30  ;;  %v1570_v36 = vpop.f32.mrb[6].mxu0  ;;  %vm2079_vm10 = vcmp.eq.s32.totalorder %v930_v33, %v932_v17  ;;  %v963_v57 = vsel %vm350_vm1, %v951_v42, -inf }
 0x4ef   :  { %v693_v38 = vpop.f32.mrb[7].mxu0  ;;  %v957_v41 = vsel %vm350_vm1, %v949_v35, -inf  ;;  %v952_v58 = vsel %vm944_vm4, %v1570_v36, -1e+30 }
 0x4f0   :  { %v950_v27 = vsel %vm942_vm13, %v693_v38, -1e+30  ;;  %958 = vmax.xlane.f32.xlu1 %v957_v41  ;;  %vm947_vm13 = vmand %vm2075_vm9, %vm2079_vm10  ;;  %v966_v0 = vsel %vm350_vm1, %v952_v58, -inf }
 0x4f1   :  { %v960_v48 = vsel %vm350_vm1, %v950_v27, -inf }
 0x4f2   :  { %961 = vmax.xlane.f32.xlu0 %v960_v48 }
 0x4f4   :  { %964 = vmax.xlane.f32.xlu1 %v963_v57  ;;  %v1573_v59 = vpop.f32.mrb[8].mxu0 }
 0x4f5   :  { %v706_v60 = vpop.f32.mrb[9].mxu0  ;;  %v955_v2 = vsel %vm947_vm13, %v1573_v59, -1e+30 }
 0x4f6   :  { %v953_v61 = vsel %vm945_vm11, %v706_v60, -1e+30  ;;  %v1574_v62 = vpop.f32.mrb[10].mxu0  ;;  %v975_v5 = vsel %vm350_vm1, %v955_v2, -inf }
 0x4f7   :  { %v709_v63 = vpop.f32.mrb[11].mxu0  ;;  %v969_v1 = vsel %vm350_vm1, %v953_v61, -inf  ;;  %v956_v7 = vsel %vm948_vm7, %v1574_v62, -1e+30 }
 0x4f8   :  { %v954_v3 = vsel %vm946_vm14, %v709_v63, -1e+30  ;;  %967 = vmax.xlane.f32.xlu1 %v966_v0  ;;  %970 = vmax.xlane.f32.xlu0 %v969_v1  ;;  %v978_v8 = vsel %vm350_vm1, %v956_v7, -inf }
 0x4f9   :  { %v972_v6 = vsel %vm350_vm1, %v954_v3, -inf }
 0x4fc   :  { %976 = vmax.xlane.f32.xlu0 %v975_v5  ;;  %973 = vmax.xlane.f32.xlu1 %v972_v6 }
 0x500   :  { %979 = vmax.xlane.f32.xlu1 %v978_v8 }
 0x57d   :  { %v959_v9 = vpop.xlane.xlu1 %958 }
 0x57e   :  { %v981_v10 = vsub.f32 %v949_v35, %v959_v9 }
 0x57f   :  { %v962_v11 = vpop.xlane.xlu0 %961 }
 0x580   :  { %v989_v14 = vmul.f32 1.442695, %v981_v10  ;;  %v982_v15 = vsub.f32 %v950_v27, %v962_v11 }
 0x581   :  { %v965_v12 = vpop.xlane.xlu1 %964 }
 0x582   :  { %v983_v13 = vsub.f32 %v951_v42, %v965_v12  ;;  %v991_v20 = vmul.f32 1.442695, %v982_v15 }
 0x584   :  { %v993_v16 = vmul.f32 1.442695, %v983_v13 }
 0x585   :  { %v968_v17 = vpop.xlane.xlu1 %967  ;;  %v971_v18 = vpop.xlane.xlu0 %970 }
 0x586   :  { %1724 = vpow2.f32 %v993_v16  ;;  %v984_v19 = vsub.f32 %v952_v58, %v968_v17  ;;  %v985_v22 = vsub.f32 %v953_v61, %v971_v18 }
 0x587   :  { %1726 = vpow2.f32 %v989_v14 }
 0x588   :  { %v995_v21 = vmul.f32 1.442695, %v984_v19  ;;  %v997_v26 = vmul.f32 1.442695, %v985_v22 }
 0x589   :  { %v977_v23 = vpop.xlane.xlu0 %976  ;;  %v974_v24 = vpop.xlane.xlu1 %973 }
 0x58a   :  { %1728 = vpow2.f32 %v995_v21  ;;  %v987_v25 = vsub.f32 %v955_v2, %v977_v23  ;;  %v986_v29 = vsub.f32 %v954_v3, %v974_v24 }
 0x58b   :  { %1730 = vpow2.f32 %v991_v20 }
 0x58c   :  { %v1001_v28 = vmul.f32 1.442695, %v987_v25  ;;  %v999_v33 = vmul.f32 1.442695, %v986_v29 }
 0x58d   :  { %v980_v30 = vpop.xlane.xlu1 %979 }
 0x58e   :  { %1732 = vpow2.f32 %v1001_v28  ;;  %v988_v31 = vsub.f32 %v956_v7, %v980_v30 }
 0x58f   :  { %1734 = vpow2.f32 %v997_v26 }
 0x590   :  { %v2112_v32 = vpop.eup %1724  ;;  %v1003_v34 = vmul.f32 1.442695, %v988_v31 }
 0x591   :  { %v1011_v35 = vsel %vm350_vm1, %v2112_v32, 0.0  ;;  %v1727_v36 = vpop.eup %1726 }
 0x592   :  { %1736 = vpow2.f32 %v1003_v34  ;;  %1012 = vadd.xlane.f32.xlu0 %v1011_v35  ;;  %v1005_v38 = vsel %vm350_vm1, %v1727_v36, 0.0 }
 0x593   :  { %1738 = vpow2.f32 %v999_v33 }
 0x594   :  { %v1729_v37 = vpop.eup %1728 }
 0x595   :  { %v1014_v41 = vsel %vm350_vm1, %v1729_v37, 0.0  ;;  %v1731_v42 = vpop.eup %1730 }
 0x596   :  { %1006 = vadd.xlane.f32.xlu0 %v1005_v38  ;;  %1015 = vadd.xlane.f32.xlu1 %v1014_v41  ;;  %v1008_v46 = vsel %vm350_vm1, %v1731_v42, 0.0  ;;  %v1138_v38 = vld [vmem:[%s2235_s3 + $0x4] ss:$0 sm:$0xff] }
 0x598   :  { %v2118_v27 = vpop.eup %1732 }
 0x599   :  { %v1023_v45 = vsel %vm350_vm1, %v2118_v27, 0.0  ;;  %v1735_v48 = vpop.eup %1734 }
 0x59a   :  { %1024 = vadd.xlane.f32.xlu0 %v1023_v45  ;;  %1009 = vadd.xlane.f32.xlu1 %v1008_v46  ;;  %v1017_v50 = vsel %vm350_vm1, %v1735_v48, 0.0 }
 0x59c   :  { %v1737_v49 = vpop.eup %1736 }
 0x59d   :  { %v1026_v51 = vsel %vm350_vm1, %v1737_v49, 0.0  ;;  %v1739_v54 = vpop.eup %1738 }
 0x59e   :  { %1018 = vadd.xlane.f32.xlu0 %v1017_v50  ;;  %1027 = vadd.xlane.f32.xlu1 %v1026_v51  ;;  %v1020_v57 = vsel %vm350_vm1, %v1739_v54, 0.0 }
 0x5a2   :  { %1021 = vadd.xlane.f32.xlu1 %v1020_v57 }
 0x5b3   :  { %1657 = vrot.lane.b32.xlu1 %v1656_v55, %s1774_s20 }
 0x5b4   :  { %1652 = vrot.lane.b32.xlu0 %v1651_v43, %s1774_s20 }
 0x61f   :  { %v1013_v58 = vpop.xlane.xlu0 %1012 }
 0x623   :  { %v1007_v59 = vpop.xlane.xlu0 %1006  ;;  %v1016_v60 = vpop.xlane.xlu1 %1015 }
 0x624   :  { %1740 = vrcp.f32 %v1007_v59 }
 0x627   :  { %v1025_v61 = vpop.xlane.xlu0 %1024  ;;  %v1010_v62 = vpop.xlane.xlu1 %1009 }
 0x628   :  { %1742 = vrcp.f32 %v1010_v62  ;;  %v1708_v62 = vld [vmem:[%s2236_s5] sm:$0xff]  }
 0x629   :  { %1744 = vrcp.f32 %v1016_v60 }
 0x62a   :  { %1746 = vrcp.f32 %v1013_v58 }
 0x62b   :  { %v1019_v63 = vpop.xlane.xlu0 %1018  ;;  %v1028_v0 = vpop.xlane.xlu1 %1027 }
 0x62c   :  { %1748 = vrcp.f32 %v1019_v63  ;;  %v1709_v63 = vld [vmem:[%s2236_s5 + $0x8] sm:$0xff]  }
 0x62e   :  { %v1741_v2 = vpop.eup %1740 }
 0x62f   :  { %v1653_v1 = vpop.permute.xlu0 %1652  ;;  %v1022_v52 = vpop.xlane.xlu1 %1021  ;;  %v1037_v6 = vmul.f32 %v1741_v2, %v1727_v36 }
 0x630   :  { %v1655_v53 = vunpack.i.h.bf16 %v1653_v1  ;;  %v1654_v55 = vunpack.i.l.bf16 %v1653_v1  ;;  %1750 = vrcp.f32 %v1022_v52  ;;  %v1711_v1 = vld [vmem:[%s2236_s5 + $0x18] sm:$0xff]  }
 0x631   :  { %1752 = vrcp.f32 %v1028_v0  ;;  %v1710_v0 = vld [vmem:[%s2236_s5 + $0x10] sm:$0xff]  }
 0x632   :  { %v1050_v39 = vpack.c.bf16 %v1655_v53, %v1654_v55  ;;  %v1743_v40 = vpop.eup %1742  ;;  %1754 = vrcp.f32 %v1025_v61 }
 0x633   :  { %v1658_v43 = vpop.permute.xlu1 %1657  ;;  %v1038_v7 = vmul.f32 %v1743_v40, %v1731_v42  ;;  %v1745_v9 = vpop.eup %1744 }
 0x634   :  { %v1660_v3 = vunpack.i.h.bf16 %v1658_v43  ;;  %v1659_v5 = vunpack.i.l.bf16 %v1658_v43  ;;  %1577 = vmatprep.subr.bf16.mxu1 %v1050_v39  ;;  %v1747_v10 = vpop.eup %1746  ;;  %v1040_v14 = vmul.f32 %v1745_v9, %v1729_v37  ;;  %v1142_v9 = vld [vmem:[%s2235_s3 + $0x3] ss:$0 sm:$0xff] }
 0x635   :  { %1578 = vmatpush3.bf16.msra.mxu1 %v1050_v39  ;;  %v1045_v8 = vpack.c.bf16 %v1038_v7, %v1037_v6  ;;  %v1039_v16 = vmul.f32 %v1747_v10, %v2112_v32 }
 0x636   :  { %1579 = vmatprep.subr.bf16.mxu1 %v2010_v56  ;;  %v1052_v11 = vpack.c.bf16 %v1660_v3, %v1659_v5  ;;  %v1749_v12 = vpop.eup %1748  ;;  %v1141_v3 = vld [vmem:[%s2235_s3 + $0x2] ss:$0 sm:$0xff] }
 0x637   :  { %1583 = vmatprep.mubr.msk.bf16.mxu1 %vm350_vm1, %v1045_v8  ;;  %v1041_v17 = vmul.f32 %v1749_v12, %v1735_v48  ;;  %v1046_v18 = vpack.c.bf16 %v1040_v14, %v1039_v16  ;;  %v1712_v14 = vld [vmem:[%s2237_s6] sm:$0xff]   ;;  %v1714_v16 = vld [vmem:[%s2237_s6 + $0x10] sm:$0xff]  }
 0x638   :  { %1604 = vmatpush3.bf16.msra.mxu0 %v1712_v14 }
 0x639   :  { %1580 = vmatpush3.bf16.msra.mxu1 %v2010_v56  ;;  %1605 = vmatprep.subr.bf16.mxu0 %v1769_v4 }
 0x63a   :  { %v1751_v13 = vpop.eup %1750  ;;  %1581 = vmatprep.subr.bf16.mxu1 %v1052_v11 }
 0x63b   :  { %v1042_v15 = vmul.f32 %v1751_v13, %v1739_v54  ;;  %v1753_v19 = vpop.eup %1752 }
 0x63c   :  { %v1755_v21 = vpop.eup %1754  ;;  %v1044_v22 = vmul.f32 %v1753_v19, %v1737_v49  ;;  %v1717_v19 = vld [vmem:[%s2237_s6 + $0x28] sm:$0xff]  }
 0x63d   :  { %1582 = vmatpush3.bf16.msra.mxu1 %v1052_v11  ;;  %v1047_v20 = vpack.c.bf16 %v1042_v15, %v1041_v17  ;;  %v1043_v56 = vmul.f32 %v1755_v21, %v2118_v27  ;;  %v1713_v15 = vld [vmem:[%s2237_s6 + $0x8] sm:$0xff]   ;;  %v1715_v17 = vld [vmem:[%s2237_s6 + $0x18] sm:$0xff]  }
 0x63e   :  { %1591 = vmatprep.subr.bf16.mxu1 %v1769_v4  ;;  %1606 = vmatpush3.bf16.msra.mxu0 %v1713_v15  ;;  %v1719_v21 = vld [vmem:[%s2237_s6 + $0x38] sm:$0xff]  }
 0x63f   :  { %v1048_v23 = vpack.c.bf16 %v1044_v22, %v1043_v56  ;;  %1607 = vmatprep.subr.bf16.mxu0 %v1769_v4  ;;  %v1182_v22 = vld [vmem:[%s2235_s3 + $0x6] ss:$0 sm:$0xff] }
 0x640   :  { %1584 = vmatmul.mubr.msk.bf16.vlgmr.msra.gmra.mrb[12].mxu1 %vm350_vm1, %v1046_v18  ;;  %v1716_v18 = vld [vmem:[%s2237_s6 + $0x20] sm:$0xff]  }
 0x641   :  { %1587 = vmatprep.mubr.msk.bf16.mxu1 %vm350_vm1, %v1047_v20  ;;  %1592 = vmatpush3.bf16.msra.mxu1 %v1708_v62  ;;  %v1718_v20 = vld [vmem:[%s2237_s6 + $0x30] sm:$0xff]  }
 0x642   :  { %1593 = vmatprep.subr.bf16.mxu1 %v1769_v4  ;;  %1608 = vmatpush3.bf16.msra.mxu0 %v1714_v16 }
 0x643   :  { %1609 = vmatprep.subr.bf16.mxu0 %v1769_v4 }
 0x645   :  { %1594 = vmatpush3.bf16.msra.mxu1 %v1709_v63 }
 0x646   :  { %1595 = vmatprep.subr.bf16.mxu1 %v1769_v4  ;;  %1610 = vmatpush3.bf16.msra.mxu0 %v1715_v17 }
 0x647   :  { %1611 = vmatprep.subr.bf16.mxu0 %v1769_v4 }
 0x648   :  { %1588 = vmatmul.mubr.msk.bf16.gmra.mrb[16].mxu1 %vm350_vm1, %v1048_v23 }
 0x649   :  { %1599 = vmatprep.mubr.msk.bf16.mxu1 %vm1770_vm2, %v1769_v4  ;;  %1596 = vmatpush3.bf16.msra.mxu1 %v1710_v0 }
 0x64a   :  { %1597 = vmatprep.subr.bf16.mxu1 %v1769_v4  ;;  %1612 = vmatpush3.bf16.msra.mxu0 %v1716_v18 }
 0x64b   :  { %1613 = vmatprep.subr.bf16.mxu0 %v1769_v4 }
 0x64d   :  { %1598 = vmatpush3.bf16.msra.mxu1 %v1711_v1 }
 0x64e   :  { %1614 = vmatpush3.bf16.msra.mxu0 %v1717_v19  ;;  %v1322_v19 = vld [vmem:[%s2235_s3 + $0x5] ss:$0 sm:$0xff] }
 0x64f   :  { %1615 = vmatprep.subr.bf16.mxu0 %v1769_v4 }
 0x652   :  { %1616 = vmatpush3.bf16.msra.mxu0 %v1718_v20 }
 0x653   :  { %1617 = vmatprep.subr.bf16.mxu0 %v1769_v4 }
 0x656   :  { %1618 = vmatpush3.bf16.msra.mxu0 %v1719_v21 }
 0x713   :  { %v1585_v24 = vpop.f32.mrb[12].mxu1 }
 0x714   :  { %v1099_v25 = vpop.f32.mrb[13].mxu1 }
 0x715   :  { %v1130_v26 = vadd.f32 %v1585_v24, %v1099_v25  ;;  %v1586_v28 = vpop.f32.mrb[14].mxu1 }
 0x716   :  { %v1102_v29 = vpop.f32.mrb[15].mxu1 }
 0x717   :  { %v1131_v30 = vadd.f32 %v1586_v28, %v1102_v29 }
 0x71b   :  { %v1589_v31 = vpop.f32.mrb[16].mxu1 }
 0x71c   :  { %v1115_v32 = vpop.f32.mrb[17].mxu1 }
 0x71d   :  { %v1132_v33 = vadd.f32 %v1130_v26, %v1115_v32  ;;  %v1590_v34 = vpop.f32.mrb[18].mxu1 }
 0x71e   :  { %v1118_v35 = vpop.f32.mrb[19].mxu1 }
 0x71f   :  { %v1134_v36 = vadd.f32 %v1589_v31, %v1132_v33  ;;  %v1133_v37 = vadd.f32 %v1131_v30, %v1118_v35 }
 0x721   :  { %v1136_v41 = vadd.f32 %v1134_v36, %v1921_v44  ;;  %v1135_v42 = vadd.f32 %v1590_v34, %v1133_v37 }
 0x723   :  { %v1137_v27 = vadd.f32 %v1135_v42, %v1923_v47  ;;  %v2150_v45 = vadd.f32 %v1138_v38, %v1136_v41 }
 0x725   :  { %v1143_v46 = vsel %vm350_vm1, %v2150_v45, 0.0  ;;  %v2154_v48 = vadd.f32 %v1138_v38, %v1137_v27 }
 0x726   :  { %1144 = vadd.xlane.f32.xlu1 %v1143_v46 }
 0x727   :  { %v1146_v49 = vsel %vm350_vm1, %v2154_v48, 0.0 }
 0x728   :  { %1147 = vadd.xlane.f32.xlu0 %v1146_v49 }
 0x7b3   :  { %v1145_v50 = vpop.xlane.xlu1 %1144 }
 0x7b4   :  { %v1149_v51 = vmul.f32 0.015625, %v1145_v50 }
 0x7b5   :  { %v1148_v54 = vpop.xlane.xlu0 %1147 }
 0x7b6   :  { %v1151_v44 = vsub.f32 %v2150_v45, %v1149_v51  ;;  %v1150_v57 = vmul.f32 0.015625, %v1148_v54 }
 0x7b8   :  { %v1152_v47 = vsub.f32 %v2154_v48, %v1150_v57  ;;  %v1153_v58 = vmul.f32 %v1151_v44, %v1151_v44 }
 0x7ba   :  { %v1155_v59 = vsel %vm350_vm1, %v1153_v58, 0.0  ;;  %v1154_v60 = vmul.f32 %v1152_v47, %v1152_v47 }
 0x7bb   :  { %1156 = vadd.xlane.f32.xlu0 %v1155_v59 }
 0x7bc   :  { %v1158_v61 = vsel %vm350_vm1, %v1154_v60, 0.0 }
 0x7bd   :  { %1159 = vadd.xlane.f32.xlu1 %v1158_v61 }
 0x848   :  { %v1157_v52 = vpop.xlane.xlu0 %1156 }
 0x849   :  { %v1161_v53 = vmul.f32 0.015625, %v1157_v52 }
 0x84a   :  { %v1160_v55 = vpop.xlane.xlu1 %1159 }
 0x84b   :  { %v1163_v2 = vadd.f32 1e-05, %v1161_v53  ;;  %v1162_v39 = vmul.f32 0.015625, %v1160_v55 }
 0x84d   :  { %1756 = vrsqrt.f32 %v1163_v2  ;;  %v1164_v40 = vadd.f32 1e-05, %v1162_v39 }
 0x84f   :  { %1758 = vrsqrt.f32 %v1164_v40 }
 0x857   :  { %v1757_v43 = vpop.eup %1756 }
 0x858   :  { %v1167_v5 = vmul.f32 %v1757_v43, %v1151_v44 }
 0x859   :  { %v1759_v6 = vpop.eup %1758 }
 0x85a   :  { %v1169_v7 = vmul.f32 %v1167_v5, %v1141_v3  ;;  %v1168_v8 = vmul.f32 %v1759_v6, %v1152_v47  ;;  %v1775_v5 = vmov -1.0  }
 0x85c   :  { %v1170_v10 = vmul.f32 %v1168_v8, %v1141_v3  ;;  %v1171_v11 = vadd.f32 %v1169_v7, %v1142_v9 }
 0x85e   :  { %v1172_v12 = vadd.f32 %v1170_v10, %v1142_v9 }
 0x860   :  { %v1173_v13 = vpack.c.bf16 %v1172_v12, %v1171_v11 }
 0x862   :  { %1600 = vmatmul.mubr.msk.bf16.vlgmr.msra.gmra.mrb[20].mxu1 %vm350_vm1, %v1173_v13 }
 0x935   :  { %v1244_v56 = vpop.f32.mrb[20].mxu1 }
 0x936   :  { %v1245_v23 = vadd.f32 %v1244_v56, %v1182_v22  ;;  %v1601_v24 = vpop.f32.mrb[21].mxu1 }
 0x937   :  { %v1247_v25 = vpop.f32.mrb[22].mxu1 }
 0x938   :  { %v1251_v26 = vmul.f32 0.70710677, %v1245_v23  ;;  %v1248_v28 = vadd.f32 %v1247_v25, %v1182_v22  ;;  %v1602_v29 = vpop.f32.mrb[23].mxu1  ;;  %v1299_v13 = vmul.f32 0.5, %v1245_v23 }
 0x93a   :  { %v1257_v30 = vand.u32 2147483647, %v1251_v26  ;;  %v1252_v31 = vmul.f32 0.70710677, %v1248_v28  ;;  %vm1253_vm2 = vcmp.ge.f32.partialorder %v1251_v26, 0.0  ;;  %v1300_v14 = vmul.f32 0.5, %v1248_v28 }
 0x93b   :  { %v1255_v6 = vsel %vm1253_vm2, 1.0, %v1775_v5 }
 0x93c   :  { %v1259_v32 = vmul.f32 0.3275911, %v1257_v30  ;;  %v1258_v4 = vand.u32 2147483647, %v1252_v31  ;;  %v1285_v36 = vsub.f32 0.0, %v1257_v30  ;;  %vm1254_vm12 = vcmp.ge.f32.partialorder %v1252_v31, 0.0 }
 0x93d   :  { %v1256_v10 = vsel %vm1254_vm12, 1.0, %v1775_v5 }
 0x93e   :  { %v1261_v33 = vadd.f32 1.0, %v1259_v32  ;;  %v1260_v34 = vmul.f32 0.3275911, %v1258_v4  ;;  %v1286_v37 = vsub.f32 0.0, %v1258_v4  ;;  %v1287_v41 = vmul.f32 %v1285_v36, %v1257_v30 }
 0x940   :  { %1760 = vrcp.f32 %v1261_v33  ;;  %v1262_v35 = vadd.f32 1.0, %v1260_v34  ;;  %v1288_v49 = vmul.f32 %v1286_v37, %v1258_v4  ;;  %v1289_v50 = vmul.f32 1.442695, %v1287_v41 }
 0x942   :  { %1762 = vrcp.f32 %v1262_v35  ;;  %v1291_v47 = vmul.f32 1.442695, %v1288_v49 }
 0x943   :  { %1764 = vpow2.f32 %v1289_v50 }
 0x944   :  { %1766 = vpow2.f32 %v1291_v47 }
 0x94a   :  { %v1761_v38 = vpop.eup %1760 }
 0x94b   :  { %v1267_v42 = vmul.f32 1.0614054, %v1761_v38 }
 0x94c   :  { %v1763_v27 = vpop.eup %1762 }
 0x94d   :  { %v1478_v46 = vadd.f32 -1.4531521, %v1267_v42  ;;  %v1268_v51 = vmul.f32 1.0614054, %v1763_v27  ;;  %v1765_v55 = vpop.eup %1764 }
 0x94e   :  { %v1767_v43 = vpop.eup %1766 }
 0x94f   :  { %v1271_v54 = vmul.f32 %v1761_v38, %v1478_v46  ;;  %v1479_v44 = vadd.f32 -1.4531521, %v1268_v51 }
 0x951   :  { %v1273_v57 = vadd.f32 1.4214138, %v1271_v54  ;;  %v1272_v58 = vmul.f32 %v1763_v27, %v1479_v44 }
 0x953   :  { %v1275_v59 = vmul.f32 %v1761_v38, %v1273_v57  ;;  %v1274_v60 = vadd.f32 1.4214138, %v1272_v58 }
 0x955   :  { %v1480_v61 = vadd.f32 -0.28449672, %v1275_v59  ;;  %v1276_v62 = vmul.f32 %v1763_v27, %v1274_v60 }
 0x957   :  { %v1279_v63 = vmul.f32 %v1761_v38, %v1480_v61  ;;  %v1481_v0 = vadd.f32 -0.28449672, %v1276_v62 }
 0x959   :  { %v1281_v1 = vadd.f32 0.2548296, %v1279_v63  ;;  %v1280_v52 = vmul.f32 %v1763_v27, %v1481_v0 }
 0x95b   :  { %v1283_v53 = vmul.f32 %v1761_v38, %v1281_v1  ;;  %v1282_v2 = vadd.f32 0.2548296, %v1280_v52 }
 0x95d   :  { %v1293_v39 = vmul.f32 %v1765_v55, %v1283_v53  ;;  %v1284_v40 = vmul.f32 %v1763_v27, %v1282_v2 }
 0x95f   :  { %v1295_v3 = vsub.f32 1.0, %v1293_v39  ;;  %v1294_v7 = vmul.f32 %v1767_v43, %v1284_v40 }
 0x961   :  { %v1297_v8 = vmul.f32 %v1295_v3, %v1255_v6  ;;  %v1296_v9 = vsub.f32 1.0, %v1294_v7 }
 0x963   :  { %v1301_v11 = vadd.f32 1.0, %v1297_v8  ;;  %v1298_v12 = vmul.f32 %v1296_v9, %v1256_v10 }
 0x965   :  { %v1302_v15 = vadd.f32 1.0, %v1298_v12  ;;  %v1303_v16 = vmul.f32 %v1301_v11, %v1299_v13 }
 0x967   :  { %v1304_v17 = vmul.f32 %v1302_v15, %v1300_v14 }
 0x969   :  { %v1305_v18 = vpack.c.bf16 %v1304_v17, %v1303_v16 }
 0x96b   :  { %1620 = vmatmul.mubr.bf16.vlgmr.msra.gmra.mrb[12].mxu0 %v1305_v18 }
 0xa3e   :  { %v1405_v20 = vpop.f32.mrb[12].mxu0 }
 0xa3f   :  { %v1406_v21 = vadd.f32 %v1405_v20, %v1322_v19  ;;  %v1621_v22 = vpop.f32.mrb[13].mxu0 }
 0xa40   :  { %v1408_v56 = vpop.f32.mrb[14].mxu0 }
 0xa41   :  { %v1412_v24 = vadd.f32 %v1406_v21, %v2150_v45  ;;  %v1409_v25 = vadd.f32 %v1408_v56, %v1322_v19  ;;  %v1622_v26 = vpop.f32.mrb[15].mxu0 }
 0xa43   :  { %1414 = vst.msk [vmem:[%s2238_s7] sm:$0xff] %vm350_vm1, %v1412_v24  ;;  %v1413_v23 = vadd.f32 %v1409_v25, %v2154_v48 }
 0xa45   :  { %1415 = vst.msk [vmem:[%s2238_s7 + $0x8] sm:$0xff] %vm350_vm1, %v1413_v23 }

</bundles_post_ra>
